<compile_context>
chip_gen: v6e
topology: v6e:2x2x1
jax: 0.10.0
libtpu: 0.0.40
codegen_flags: <defaults>
</compile_context>

<pallas_src>
import jax
import jax.numpy as jnp
from jax.experimental import pallas as pl
from jax.experimental.pallas import tpu as pltpu


def _round_up(n, m):
    return ((n + m - 1) // m) * m


def _cdiv(a, b):
    return (a + b - 1) // b


# ---------------------------------------------------------------------------
# Pallas kernel: one (tower, batch-tile) step of the BayesCap MLP forward
# ---------------------------------------------------------------------------
def _bayescap_kernel(
    x_ref,
    # backbone ("mod"): BayesLinear -> ReLU -> BayesLinear -> ReLU -> BayesLinear
    w1_ref, b1_ref, w2_ref, b2_ref, w3_ref, b3_ref,
    # heads, layer 1 fused: [wm1 | wa1 | wb1] -> (D, 3D)
    wh1_ref, bh1_ref,
    # heads, layer 2 stacked: (3, D, D) / (3, 1, D) in order [mu, alpha, beta]
    wh2_ref, bh2_ref,
    # merged output slab: (TB, 3D) = [mu | alpha | beta]
    out_ref,
):
    D = x_ref.shape[-1]
    x = x_ref[...]  # (TB, D) f32

    def lin(h, w, b):
        # bf16 x bf16 -> MXU bf16 path, f32 accumulation; bias add in f32.
        return (
            jnp.dot(h.astype(jnp.bfloat16), w, preferred_element_type=jnp.float32)
            + b
        )

    def relu(v):
        return jnp.maximum(v, 0.0)

    # backbone
    h = relu(lin(x, w1_ref[...], b1_ref[...]))
    h = relu(lin(h, w2_ref[...], b2_ref[...]))
    x_intr = lin(h, w3_ref[...], b3_ref[...]) + x  # residual (f32)

    # fused head layer-1: one lane-dense (TB, D) @ (D, 3D); all three heads
    # apply ReLU after their first Linear, so a single ReLU is correct.
    h_heads = relu(lin(x_intr, wh1_ref[...], bh1_ref[...]))  # (TB, 3D)

    x_mu = lin(h_heads[:, 0 * D:1 * D], wh2_ref[0], bh2_ref[0])        # no final ReLU
    x_al = relu(lin(h_heads[:, 1 * D:2 * D], wh2_ref[1], bh2_ref[1]))  # final ReLU
    x_be = relu(lin(h_heads[:, 2 * D:3 * D], wh2_ref[2], bh2_ref[2]))  # final ReLU

    # One 3D-lane-wide unmasked store (single output DMA stream per step).
    out_ref[...] = jnp.concatenate([x_mu, x_al, x_be], axis=-1).astype(out_ref.dtype)


# ---------------------------------------------------------------------------
# Wrapper: fused (multi-tower, batch-tiled) pallas_call
# ---------------------------------------------------------------------------
def _vmem_budget_bytes(TB, D, H):
    """Rough per-step VMEM budget: double-buffered I/O + weights + live tiles."""
    bf16, f32 = 2, 4
    w_bytes = (D * H + H * H + H * D + D * 3 * D + 3 * D * D) * bf16
    b_bytes = (H + H + D + 3 * D + 3 * D) * f32
    x_buf = 2 * TB * D * f32            # input tile, double-buffered
    o_buf = 2 * TB * 3 * D * f32        # output slab tile, double-buffered
    live = TB * f32 * (H + D + 3 * D + 3 * D)  # h, x_intr, h_heads, concat result
    return 2 * (w_bytes + b_bytes) + x_buf + o_buf + live


def bayescap_stacked_forward(x, packed):
    """x: (T, B, D) f32 stacked tower inputs; packed: dict of stacked params.

    Returns a merged slab of shape (T, B, 3*D) f32 = [mu | alpha | beta] on the
    last axis (lane-dense single output stream; split in the caller if needed).
    """
    T, B, D = x.shape
    H = packed["w1"].shape[-1]

    # Batch tile: up to 512 rows (amortize per-step overhead; fits v7x VMEM).
    TB = min(512, _round_up(B, 8))
    NB = _cdiv(B, TB)
    # Single-tower case: make sure there are >= 2 batch blocks so the batch
    # axis can still split across both v7x TensorCores.
    if T == 1 and NB == 1 and B >= 16:
        TB = _round_up(_cdiv(B, 2), 8)
        NB = _cdiv(B, TB)
    grid = (T, NB)

    def act_spec(width):
        # tower dim squeezed; block index varies with both grid axes
        return pl.BlockSpec((None, TB, width), lambda t, b: (t, b, 0))

    def w_spec(shape):
        # tower dim squeezed; constant block index across the batch axis
        # -> weights stay resident in VMEM while the batch sweep runs.
        nd = len(shape)
        return pl.BlockSpec((None,) + shape, lambda t, b, _nd=nd: (t,) + (0,) * _nd)

    in_specs = [
        act_spec(D),                                  # x
        w_spec((D, H)), w_spec((1, H)),               # w1, b1
        w_spec((H, H)), w_spec((1, H)),               # w2, b2
        w_spec((H, D)), w_spec((1, D)),               # w3, b3
        w_spec((D, 3 * D)), w_spec((1, 3 * D)),       # fused head layer-1
        w_spec((3, D, D)), w_spec((3, 1, D)),         # stacked head layer-2
    ]
    out_specs = act_spec(3 * D)
    out_shape = jax.ShapeDtypeStruct((T, B, 3 * D), jnp.float32)

    inputs = (
        x,
        packed["w1"], packed["b1"], packed["w2"], packed["b2"],
        packed["w3"], packed["b3"],
        packed["wh1"], packed["bh1"], packed["wh2"], packed["bh2"],
    )

    # Advisory cost estimate so XLA overlaps this small call with other work.
    flops = 2 * T * B * (D * H + H * H + H * D + D * 3 * D + 3 * D * D)
    bytes_accessed = sum(int(a.size) * a.dtype.itemsize for a in inputs)
    bytes_accessed += T * B * 3 * D * 4  # f32 output slab

    # Explicit VMEM budget (with headroom); never exceed v7x's 64 MiB physical.
    vmem_limit = min(max(4 * _vmem_budget_bytes(TB, D, H), 32 << 20), 64 << 20)

    slab = pl.pallas_call(
        _bayescap_kernel,
        out_shape=out_shape,
        grid=grid,
        in_specs=in_specs,
        out_specs=out_specs,
        compiler_params=pltpu.CompilerParams(
            dimension_semantics=("parallel", "parallel"),
            vmem_limit_bytes=int(vmem_limit),
        ),
        cost_estimate=pl.CostEstimate(
            flops=flops, transcendentals=0, bytes_accessed=bytes_accessed
        ),
    )(*inputs)
    return slab


# ---------------------------------------------------------------------------
# Deterministic parameter construction (synthetic init, no checkpoint load)
# ---------------------------------------------------------------------------
def _sample_bayes_linear(key, in_f, out_f, prior_mu, prior_sigma):
    """Effective sampled weights of a torchbnn BayesLinear layer (W = mu + sigma*eps)."""
    k_wmu, k_weps, k_bmu, k_beps = jax.random.split(key, 4)
    w_mu = 0.02 * jax.random.normal(k_wmu, (out_f, in_f), jnp.float32)
    w_log_sigma = jnp.full((out_f, in_f), jnp.log(prior_sigma), jnp.float32)
    w_eps = jax.random.normal(k_weps, (out_f, in_f), jnp.float32)
    w = w_mu + jnp.exp(w_log_sigma) * w_eps

    b_mu = 0.02 * jax.random.normal(k_bmu, (out_f,), jnp.float32)
    b_log_sigma = jnp.full((out_f,), jnp.log(prior_sigma), jnp.float32)
    b_eps = jax.random.normal(k_beps, (out_f,), jnp.float32)
    b = b_mu + jnp.exp(b_log_sigma) * b_eps

    # pre-transpose for the kernel: (in, out), bias as (1, out)
    return w.T, b.reshape(1, out_f)


def _init_linear(key, in_f, out_f):
    """Plain nn.Linear-style deterministic init, pre-transposed."""
    k_w, k_b = jax.random.split(key)
    scale = 1.0 / jnp.sqrt(jnp.float32(in_f))
    w = scale * jax.random.normal(k_w, (out_f, in_f), jnp.float32)
    b = scale * jax.random.normal(k_b, (out_f,), jnp.float32)
    return w.T, b.reshape(1, out_f)


def make_tower_params(key, inp_dim, out_dim, hid_dim, prior_mu, prior_sigma):
    """Parameters for one BayesCap_MLP_BBB_Enc (num_layers=3)."""
    keys = jax.random.split(key, 9)
    p = {}
    p["w1"], p["b1"] = _sample_bayes_linear(keys[0], inp_dim, hid_dim, prior_mu, prior_sigma)
    p["w2"], p["b2"] = _sample_bayes_linear(keys[1], hid_dim, hid_dim, prior_mu, prior_sigma)
    p["w3"], p["b3"] = _sample_bayes_linear(keys[2], hid_dim, out_dim, prior_mu, prior_sigma)
    p["wm1"], p["bm1"] = _init_linear(keys[3], out_dim, out_dim)
    p["wm2"], p["bm2"] = _init_linear(keys[4], out_dim, out_dim)
    p["wa1"], p["ba1"] = _init_linear(keys[5], out_dim, out_dim)
    p["wa2"], p["ba2"] = _init_linear(keys[6], out_dim, out_dim)
    p["wb1"], p["bb1"] = _init_linear(keys[7], out_dim, out_dim)
    p["wb2"], p["bb2"] = _init_linear(keys[8], out_dim, out_dim)
    return p


def pack_towers(tower_params):
    """Stack per-tower params into the fused kernel layout (bf16 weights, f32 biases)."""
    bf16 = jnp.bfloat16

    def stack(name):
        return jnp.stack([t[name] for t in tower_params])

    return {
        "w1": stack("w1").astype(bf16), "b1": stack("b1"),
        "w2": stack("w2").astype(bf16), "b2": stack("b2"),
        "w3": stack("w3").astype(bf16), "b3": stack("b3"),
        # head layer 1: concat [mu | alpha | beta] along output axis -> (T, D, 3D)
        "wh1": jnp.stack(
            [jnp.concatenate([t["wm1"], t["wa1"], t["wb1"]], axis=1) for t in tower_params]
        ).astype(bf16),
        "bh1": jnp.stack(
            [jnp.concatenate([t["bm1"], t["ba1"], t["bb1"]], axis=1) for t in tower_params]
        ),
        # head layer 2: stacked -> (T, 3, D, D) / (T, 3, 1, D)
        "wh2": jnp.stack(
            [jnp.stack([t["wm2"], t["wa2"], t["wb2"]]) for t in tower_params]
        ).astype(bf16),
        "bh2": jnp.stack(
            [jnp.stack([t["bm2"], t["ba2"], t["bb2"]]) for t in tower_params]
        ),
    }


def bayescap_for_clip_forward(i_features, t_features, img_params, txt_params):
    """Mirrors BayesCap_for_CLIP_BBB_Enc.forward (both towers in ONE pallas_call)."""
    feats, params, tags = [], [], []
    if i_features is not None:
        feats.append(i_features); params.append(img_params); tags.append("img")
    if t_features is not None:
        feats.append(t_features); params.append(txt_params); tags.append("txt")
    if not feats:
        return (None, None, None), (None, None, None)

    x = jnp.stack(feats)  # (T, B, D)
    D = x.shape[-1]
    packed = pack_towers(params)
    slab = bayescap_stacked_forward(x, packed)  # (T, B, 3D)

    results = {"img": (None, None, None), "txt": (None, None, None)}
    for idx, tag in enumerate(tags):
        results[tag] = (
            slab[idx, :, 0 * D:1 * D],
            slab[idx, :, 1 * D:2 * D],
            slab[idx, :, 2 * D:3 * D],
        )
    return results["img"], results["txt"]


# ---------------------------------------------------------------------------
# Pure-JAX reference (same bf16-matmul / f32-accumulate numerics as the kernel)
# ---------------------------------------------------------------------------
def _ref_tower(x, p):
    bf16 = jnp.bfloat16

    def lin(h, w, b):
        return jnp.dot(h.astype(bf16), w.astype(bf16),
                       preferred_element_type=jnp.float32) + b

    relu = lambda v: jnp.maximum(v, 0.0)
    h = relu(lin(x, p["w1"], p["b1"]))
    h = relu(lin(h, p["w2"], p["b2"]))
    x_intr = lin(h, p["w3"], p["b3"]) + x
    mu = lin(relu(lin(x_intr, p["wm1"], p["bm1"])), p["wm2"], p["bm2"])
    alpha = relu(lin(relu(lin(x_intr, p["wa1"], p["ba1"])), p["wa2"], p["ba2"]))
    beta = relu(lin(relu(lin(x_intr, p["wb1"], p["bb1"])), p["wb2"], p["bb2"]))
    return mu, alpha, beta


if __name__ == "__main__":
    # Small shapes consistent with the module (residual requires inp_dim == out_dim).
    B, INP_DIM, OUT_DIM, HID_DIM = 8, 128, 128, 256
    PRIOR_MU, PRIOR_SIGMA = 0.5, 0.1

    root = jax.random.PRNGKey(0)
    k_img, k_txt, k_xi, k_xt = jax.random.split(root, 4)

    img_params = make_tower_params(k_img, INP_DIM, OUT_DIM, HID_DIM, PRIOR_MU, PRIOR_SIGMA)
    txt_params = make_tower_params(k_txt, INP_DIM, OUT_DIM, HID_DIM, PRIOR_MU, PRIOR_SIGMA)

    i_features = jax.random.normal(k_xi, (B, INP_DIM), jnp.float32)
    t_features = jax.random.normal(k_xt, (B, INP_DIM), jnp.float32)

    (img_mu, img_1alpha, img_beta), (txt_mu, txt_1alpha, txt_beta) = (
        bayescap_for_clip_forward(i_features, t_features, img_params, txt_params)
    )
    jax.block_until_ready(
        (img_mu, img_1alpha, img_beta, txt_mu, txt_1alpha, txt_beta)
    )

    # sanity check vs pure-JAX reference (same bf16/f32 numerics)
    ref_img = _ref_tower(i_features, img_params)
    ref_txt = _ref_tower(t_features, txt_params)
    for got, ref in zip(
        (img_mu, img_1alpha, img_beta, txt_mu, txt_1alpha, txt_beta),
        (*ref_img, *ref_txt),
    ):
        assert got.shape == (B, OUT_DIM) and got.dtype == jnp.float32
        err = float(jnp.max(jnp.abs(got - ref)))
        assert jnp.allclose(got, ref, atol=2e-2, rtol=2e-2), err

    print("KERNEL_OK")
</pallas_src>

<mosaic_0001>
module attributes {stable_mosaic.version = 11 : i64} {
  func.func @_bayescap_kernel(%arg0: i32, %arg1: i32, %arg2: memref<1x8x128xf32, #tpu.memory_space<vmem>>, %arg3: memref<1x128x256xbf16, #tpu.memory_space<vmem>>, %arg4: memref<1x1x256xf32, #tpu.memory_space<vmem>>, %arg5: memref<1x256x256xbf16, #tpu.memory_space<vmem>>, %arg6: memref<1x1x256xf32, #tpu.memory_space<vmem>>, %arg7: memref<1x256x128xbf16, #tpu.memory_space<vmem>>, %arg8: memref<1x1x128xf32, #tpu.memory_space<vmem>>, %arg9: memref<1x128x384xbf16, #tpu.memory_space<vmem>>, %arg10: memref<1x1x384xf32, #tpu.memory_space<vmem>>, %arg11: memref<1x3x128x128xbf16, #tpu.memory_space<vmem>>, %arg12: memref<1x3x1x128xf32, #tpu.memory_space<vmem>>, %arg13: memref<1x8x384xf32, #tpu.memory_space<vmem>>) attributes {dimension_semantics = [#tpu.dimension_semantics<parallel>, #tpu.dimension_semantics<parallel>], iteration_bounds = array<i64: 2, 1>, scalar_prefetch = 0 : i64, scratch_operands = 0 : i64, tpu.core_type = #tpu.core_type<tc>, window_params = [{transform_indices = @transform_0, window_bounds = array<i64: 1, 8, 128>}, {transform_indices = @transform_1, window_bounds = array<i64: 1, 128, 256>}, {transform_indices = @transform_2, window_bounds = array<i64: 1, 1, 256>}, {transform_indices = @transform_3, window_bounds = array<i64: 1, 256, 256>}, {transform_indices = @transform_4, window_bounds = array<i64: 1, 1, 256>}, {transform_indices = @transform_5, window_bounds = array<i64: 1, 256, 128>}, {transform_indices = @transform_6, window_bounds = array<i64: 1, 1, 128>}, {transform_indices = @transform_7, window_bounds = array<i64: 1, 128, 384>}, {transform_indices = @transform_8, window_bounds = array<i64: 1, 1, 384>}, {transform_indices = @transform_9, window_bounds = array<i64: 1, 3, 128, 128>}, {transform_indices = @transform_10, window_bounds = array<i64: 1, 3, 1, 128>}, {transform_indices = @transform_11, window_bounds = array<i64: 1, 8, 384>}]} {
    %c0 = arith.constant 0 : index
    %c0_0 = arith.constant 0 : index
    %c0_1 = arith.constant 0 : index
    %0 = vector.load %arg2[%c0, %c0_0, %c0_1] : memref<1x8x128xf32, #tpu.memory_space<vmem>>, vector<1x8x128xf32>
    %1 = vector.shape_cast %0 : vector<1x8x128xf32> to vector<8x128xf32>
    %c0_2 = arith.constant 0 : index
    %c0_3 = arith.constant 0 : index
    %c0_4 = arith.constant 0 : index
    %2 = vector.load %arg3[%c0_2, %c0_3, %c0_4] : memref<1x128x256xbf16, #tpu.memory_space<vmem>>, vector<1x128x256xbf16>
    %3 = vector.shape_cast %2 : vector<1x128x256xbf16> to vector<128x256xbf16>
    %c0_5 = arith.constant 0 : index
    %c0_6 = arith.constant 0 : index
    %c0_7 = arith.constant 0 : index
    %4 = vector.load %arg4[%c0_5, %c0_6, %c0_7] : memref<1x1x256xf32, #tpu.memory_space<vmem>>, vector<1x1x256xf32>
    %5 = vector.shape_cast %4 : vector<1x1x256xf32> to vector<1x256xf32>
    %6 = arith.truncf %1 : vector<8x128xf32> to vector<8x128xbf16>
    %cst = arith.constant dense<0.000000e+00> : vector<8x256xf32>
    %7 = tpu.matmul %6, %3, %cst {dimension_numbers = #tpu.dot_dimension_numbers<[1], [0], [0], [1], [0, 0, 1, 1], [], []>} : vector<8x128xbf16>, vector<128x256xbf16>, vector<8x256xf32> -> vector<8x256xf32>
    %8 = vector.broadcast %5 : vector<1x256xf32> to vector<8x256xf32>
    %9 = arith.addf %7, %8 : vector<8x256xf32>
    %cst_8 = arith.constant 0.000000e+00 : f32
    %10 = vector.broadcast %cst_8 : f32 to vector<8x256xf32>
    %11 = arith.maximumf %9, %10 : vector<8x256xf32>
    %c0_9 = arith.constant 0 : index
    %c0_10 = arith.constant 0 : index
    %c0_11 = arith.constant 0 : index
    %12 = vector.load %arg5[%c0_9, %c0_10, %c0_11] : memref<1x256x256xbf16, #tpu.memory_space<vmem>>, vector<1x256x256xbf16>
    %13 = vector.shape_cast %12 : vector<1x256x256xbf16> to vector<256x256xbf16>
    %c0_12 = arith.constant 0 : index
    %c0_13 = arith.constant 0 : index
    %c0_14 = arith.constant 0 : index
    %14 = vector.load %arg6[%c0_12, %c0_13, %c0_14] : memref<1x1x256xf32, #tpu.memory_space<vmem>>, vector<1x1x256xf32>
    %15 = vector.shape_cast %14 : vector<1x1x256xf32> to vector<1x256xf32>
    %16 = arith.truncf %11 : vector<8x256xf32> to vector<8x256xbf16>
    %cst_15 = arith.constant dense<0.000000e+00> : vector<8x256xf32>
    %17 = tpu.matmul %16, %13, %cst_15 {dimension_numbers = #tpu.dot_dimension_numbers<[1], [0], [0], [1], [0, 0, 1, 1], [], []>} : vector<8x256xbf16>, vector<256x256xbf16>, vector<8x256xf32> -> vector<8x256xf32>
    %18 = vector.broadcast %15 : vector<1x256xf32> to vector<8x256xf32>
    %19 = arith.addf %17, %18 : vector<8x256xf32>
    %cst_16 = arith.constant 0.000000e+00 : f32
    %20 = vector.broadcast %cst_16 : f32 to vector<8x256xf32>
    %21 = arith.maximumf %19, %20 : vector<8x256xf32>
    %c0_17 = arith.constant 0 : index
    %c0_18 = arith.constant 0 : index
    %c0_19 = arith.constant 0 : index
    %22 = vector.load %arg7[%c0_17, %c0_18, %c0_19] : memref<1x256x128xbf16, #tpu.memory_space<vmem>>, vector<1x256x128xbf16>
    %23 = vector.shape_cast %22 : vector<1x256x128xbf16> to vector<256x128xbf16>
    %c0_20 = arith.constant 0 : index
    %c0_21 = arith.constant 0 : index
    %c0_22 = arith.constant 0 : index
    %24 = vector.load %arg8[%c0_20, %c0_21, %c0_22] : memref<1x1x128xf32, #tpu.memory_space<vmem>>, vector<1x1x128xf32>
    %25 = vector.shape_cast %24 : vector<1x1x128xf32> to vector<1x128xf32>
    %26 = arith.truncf %21 : vector<8x256xf32> to vector<8x256xbf16>
    %cst_23 = arith.constant dense<0.000000e+00> : vector<8x128xf32>
    %27 = tpu.matmul %26, %23, %cst_23 {dimension_numbers = #tpu.dot_dimension_numbers<[1], [0], [0], [1], [0, 0, 1, 1], [], []>} : vector<8x256xbf16>, vector<256x128xbf16>, vector<8x128xf32> -> vector<8x128xf32>
    %28 = vector.broadcast %25 : vector<1x128xf32> to vector<8x128xf32>
    %29 = arith.addf %27, %28 : vector<8x128xf32>
    %30 = arith.addf %29, %1 : vector<8x128xf32>
    %c0_24 = arith.constant 0 : index
    %c0_25 = arith.constant 0 : index
    %c0_26 = arith.constant 0 : index
    %31 = vector.load %arg9[%c0_24, %c0_25, %c0_26] : memref<1x128x384xbf16, #tpu.memory_space<vmem>>, vector<1x128x384xbf16>
    %32 = vector.shape_cast %31 : vector<1x128x384xbf16> to vector<128x384xbf16>
    %c0_27 = arith.constant 0 : index
    %c0_28 = arith.constant 0 : index
    %c0_29 = arith.constant 0 : index
    %33 = vector.load %arg10[%c0_27, %c0_28, %c0_29] : memref<1x1x384xf32, #tpu.memory_space<vmem>>, vector<1x1x384xf32>
    %34 = vector.shape_cast %33 : vector<1x1x384xf32> to vector<1x384xf32>
    %35 = arith.truncf %30 : vector<8x128xf32> to vector<8x128xbf16>
    %cst_30 = arith.constant dense<0.000000e+00> : vector<8x384xf32>
    %36 = tpu.matmul %35, %32, %cst_30 {dimension_numbers = #tpu.dot_dimension_numbers<[1], [0], [0], [1], [0, 0, 1, 1], [], []>} : vector<8x128xbf16>, vector<128x384xbf16>, vector<8x384xf32> -> vector<8x384xf32>
    %37 = vector.broadcast %34 : vector<1x384xf32> to vector<8x384xf32>
    %38 = arith.addf %36, %37 : vector<8x384xf32>
    %cst_31 = arith.constant 0.000000e+00 : f32
    %39 = vector.broadcast %cst_31 : f32 to vector<8x384xf32>
    %40 = arith.maximumf %38, %39 : vector<8x384xf32>
    %41 = vector.extract_strided_slice %40 {offsets = [0, 0], sizes = [8, 128], strides = [1, 1]} : vector<8x384xf32> to vector<8x128xf32>
    %c0_32 = arith.constant 0 : index
    %c0_33 = arith.constant 0 : index
    %c0_34 = arith.constant 0 : index
    %c0_35 = arith.constant 0 : index
    %42 = vector.load %arg11[%c0_32, %c0_33, %c0_34, %c0_35] : memref<1x3x128x128xbf16, #tpu.memory_space<vmem>>, vector<1x1x128x128xbf16>
    %43 = vector.shape_cast %42 : vector<1x1x128x128xbf16> to vector<128x128xbf16>
    %c0_36 = arith.constant 0 : index
    %c0_37 = arith.constant 0 : index
    %c0_38 = arith.constant 0 : index
    %c0_39 = arith.constant 0 : index
    %44 = vector.load %arg12[%c0_36, %c0_37, %c0_38, %c0_39] : memref<1x3x1x128xf32, #tpu.memory_space<vmem>>, vector<1x1x1x128xf32>
    %45 = vector.shape_cast %44 : vector<1x1x1x128xf32> to vector<1x128xf32>
    %46 = arith.truncf %41 : vector<8x128xf32> to vector<8x128xbf16>
    %cst_40 = arith.constant dense<0.000000e+00> : vector<8x128xf32>
    %47 = tpu.matmul %46, %43, %cst_40 {dimension_numbers = #tpu.dot_dimension_numbers<[1], [0], [0], [1], [0, 0, 1, 1], [], []>} : vector<8x128xbf16>, vector<128x128xbf16>, vector<8x128xf32> -> vector<8x128xf32>
    %48 = vector.broadcast %45 : vector<1x128xf32> to vector<8x128xf32>
    %49 = arith.addf %47, %48 : vector<8x128xf32>
    %50 = vector.extract_strided_slice %40 {offsets = [0, 128], sizes = [8, 128], strides = [1, 1]} : vector<8x384xf32> to vector<8x128xf32>
    %c0_41 = arith.constant 0 : index
    %c1 = arith.constant 1 : index
    %c0_42 = arith.constant 0 : index
    %c0_43 = arith.constant 0 : index
    %51 = vector.load %arg11[%c0_41, %c1, %c0_42, %c0_43] : memref<1x3x128x128xbf16, #tpu.memory_space<vmem>>, vector<1x1x128x128xbf16>
    %52 = vector.shape_cast %51 : vector<1x1x128x128xbf16> to vector<128x128xbf16>
    %c0_44 = arith.constant 0 : index
    %c1_45 = arith.constant 1 : index
    %c0_46 = arith.constant 0 : index
    %c0_47 = arith.constant 0 : index
    %53 = vector.load %arg12[%c0_44, %c1_45, %c0_46, %c0_47] : memref<1x3x1x128xf32, #tpu.memory_space<vmem>>, vector<1x1x1x128xf32>
    %54 = vector.shape_cast %53 : vector<1x1x1x128xf32> to vector<1x128xf32>
    %55 = arith.truncf %50 : vector<8x128xf32> to vector<8x128xbf16>
    %cst_48 = arith.constant dense<0.000000e+00> : vector<8x128xf32>
    %56 = tpu.matmul %55, %52, %cst_48 {dimension_numbers = #tpu.dot_dimension_numbers<[1], [0], [0], [1], [0, 0, 1, 1], [], []>} : vector<8x128xbf16>, vector<128x128xbf16>, vector<8x128xf32> -> vector<8x128xf32>
    %57 = vector.broadcast %54 : vector<1x128xf32> to vector<8x128xf32>
    %58 = arith.addf %56, %57 : vector<8x128xf32>
    %cst_49 = arith.constant 0.000000e+00 : f32
    %59 = vector.broadcast %cst_49 : f32 to vector<8x128xf32>
    %60 = arith.maximumf %58, %59 : vector<8x128xf32>
    %61 = vector.extract_strided_slice %40 {offsets = [0, 256], sizes = [8, 128], strides = [1, 1]} : vector<8x384xf32> to vector<8x128xf32>
    %c0_50 = arith.constant 0 : index
    %c2 = arith.constant 2 : index
    %c0_51 = arith.constant 0 : index
    %c0_52 = arith.constant 0 : index
    %62 = vector.load %arg11[%c0_50, %c2, %c0_51, %c0_52] : memref<1x3x128x128xbf16, #tpu.memory_space<vmem>>, vector<1x1x128x128xbf16>
    %63 = vector.shape_cast %62 : vector<1x1x128x128xbf16> to vector<128x128xbf16>
    %c0_53 = arith.constant 0 : index
    %c2_54 = arith.constant 2 : index
    %c0_55 = arith.constant 0 : index
    %c0_56 = arith.constant 0 : index
    %64 = vector.load %arg12[%c0_53, %c2_54, %c0_55, %c0_56] : memref<1x3x1x128xf32, #tpu.memory_space<vmem>>, vector<1x1x1x128xf32>
    %65 = vector.shape_cast %64 : vector<1x1x1x128xf32> to vector<1x128xf32>
    %66 = arith.truncf %61 : vector<8x128xf32> to vector<8x128xbf16>
    %cst_57 = arith.constant dense<0.000000e+00> : vector<8x128xf32>
    %67 = tpu.matmul %66, %63, %cst_57 {dimension_numbers = #tpu.dot_dimension_numbers<[1], [0], [0], [1], [0, 0, 1, 1], [], []>} : vector<8x128xbf16>, vector<128x128xbf16>, vector<8x128xf32> -> vector<8x128xf32>
    %68 = vector.broadcast %65 : vector<1x128xf32> to vector<8x128xf32>
    %69 = arith.addf %67, %68 : vector<8x128xf32>
    %cst_58 = arith.constant 0.000000e+00 : f32
    %70 = vector.broadcast %cst_58 : f32 to vector<8x128xf32>
    %71 = arith.maximumf %69, %70 : vector<8x128xf32>
    %72 = tpu.concatenate %49, %60, %71 in 1 : vector<8x128xf32>, vector<8x128xf32>, vector<8x128xf32> -> vector<8x384xf32>
    %c0_59 = arith.constant 0 : index
    %c0_60 = arith.constant 0 : index
    %c0_61 = arith.constant 0 : index
    %73 = vector.load %arg13[%c0_59, %c0_60, %c0_61] : memref<1x8x384xf32, #tpu.memory_space<vmem>>, vector<1x8x384xf32>
    %74 = vector.shape_cast %73 : vector<1x8x384xf32> to vector<8x384xf32>
    %75 = vector.shape_cast %72 : vector<8x384xf32> to vector<1x8x384xf32>
    tpu.vector_store %arg13[%c0_59, %c0_60, %c0_61], %75 {strides = array<i32>} : memref<1x8x384xf32, #tpu.memory_space<vmem>>, vector<1x8x384xf32>,
    return
  }
  func.func @transform_0(%arg0: i32, %arg1: i32) -> (i32, i32, i32) {
    %c0_i32 = arith.constant 0 : i32
    %c0_i32_0 = arith.constant 0 : i32
    return %arg0, %arg1, %c0_i32 : i32, i32, i32
  }
  func.func @transform_1(%arg0: i32, %arg1: i32) -> (i32, i32, i32) {
    %c0_i32 = arith.constant 0 : i32
    %c0_i32_0 = arith.constant 0 : i32
    %c0_i32_1 = arith.constant 0 : i32
    return %arg0, %c0_i32, %c0_i32_0 : i32, i32, i32
  }
  func.func @transform_2(%arg0: i32, %arg1: i32) -> (i32, i32, i32) {
    %c0_i32 = arith.constant 0 : i32
    %c0_i32_0 = arith.constant 0 : i32
    %c0_i32_1 = arith.constant 0 : i32
    return %arg0, %c0_i32, %c0_i32_0 : i32, i32, i32
  }
  func.func @transform_3(%arg0: i32, %arg1: i32) -> (i32, i32, i32) {
    %c0_i32 = arith.constant 0 : i32
    %c0_i32_0 = arith.constant 0 : i32
    %c0_i32_1 = arith.constant 0 : i32
    return %arg0, %c0_i32, %c0_i32_0 : i32, i32, i32
  }
  func.func @transform_4(%arg0: i32, %arg1: i32) -> (i32, i32, i32) {
    %c0_i32 = arith.constant 0 : i32
    %c0_i32_0 = arith.constant 0 : i32
    %c0_i32_1 = arith.constant 0 : i32
    return %arg0, %c0_i32, %c0_i32_0 : i32, i32, i32
  }
  func.func @transform_5(%arg0: i32, %arg1: i32) -> (i32, i32, i32) {
    %c0_i32 = arith.constant 0 : i32
    %c0_i32_0 = arith.constant 0 : i32
    %c0_i32_1 = arith.constant 0 : i32
    return %arg0, %c0_i32, %c0_i32_0 : i32, i32, i32
  }
  func.func @transform_6(%arg0: i32, %arg1: i32) -> (i32, i32, i32) {
    %c0_i32 = arith.constant 0 : i32
    %c0_i32_0 = arith.constant 0 : i32
    %c0_i32_1 = arith.constant 0 : i32
    return %arg0, %c0_i32, %c0_i32_0 : i32, i32, i32
  }
  func.func @transform_7(%arg0: i32, %arg1: i32) -> (i32, i32, i32) {
    %c0_i32 = arith.constant 0 : i32
    %c0_i32_0 = arith.constant 0 : i32
    %c0_i32_1 = arith.constant 0 : i32
    return %arg0, %c0_i32, %c0_i32_0 : i32, i32, i32
  }
  func.func @transform_8(%arg0: i32, %arg1: i32) -> (i32, i32, i32) {
    %c0_i32 = arith.constant 0 : i32
    %c0_i32_0 = arith.constant 0 : i32
    %c0_i32_1 = arith.constant 0 : i32
    return %arg0, %c0_i32, %c0_i32_0 : i32, i32, i32
  }
  func.func @transform_9(%arg0: i32, %arg1: i32) -> (i32, i32, i32, i32) {
    %c0_i32 = arith.constant 0 : i32
    %c0_i32_0 = arith.constant 0 : i32
    %c0_i32_1 = arith.constant 0 : i32
    %c0_i32_2 = arith.constant 0 : i32
    return %arg0, %c0_i32, %c0_i32_0, %c0_i32_1 : i32, i32, i32, i32
  }
  func.func @transform_10(%arg0: i32, %arg1: i32) -> (i32, i32, i32, i32) {
    %c0_i32 = arith.constant 0 : i32
    %c0_i32_0 = arith.constant 0 : i32
    %c0_i32_1 = arith.constant 0 : i32
    %c0_i32_2 = arith.constant 0 : i32
    return %arg0, %c0_i32, %c0_i32_0, %c0_i32_1 : i32, i32, i32, i32
  }
  func.func @transform_11(%arg0: i32, %arg1: i32) -> (i32, i32, i32) {
    %c0_i32 = arith.constant 0 : i32
    %c0_i32_0 = arith.constant 0 : i32
    return %arg0, %arg1, %c0_i32 : i32, i32, i32
  }
}

</mosaic_0001>

<bundles_post_ra>
// kernel: tpu_custom_call.1
= control target key start
LH: loop header
LB: loop body
LE: loop exit
PB: predicated region body
PF: predicated region fallthrough
CT: control target
= control target key end

     0   :  { %s3770_s0 = inlined_call_operand.hbm [shape: f32[2,8,128], index: 0, kind: input, shape index: {}]   ;;  %s3771_s1 = inlined_call_operand.hbm [shape: bf16[2,128,256], index: 1, kind: input, shape index: {}]   ;;  %s3772_s2 = inlined_call_operand.hbm [shape: f32[2,1,256], index: 2, kind: input, shape index: {}]   ;;  %s3773_s3 = inlined_call_operand.hbm [shape: bf16[2,256,256], index: 3, kind: input, shape index: {}]   ;;  %s3774_s4 = inlined_call_operand.hbm [shape: f32[2,1,256], index: 4, kind: input, shape index: {}]   ;;  %s3775_s5 = inlined_call_operand.hbm [shape: bf16[2,256,128], index: 5, kind: input, shape index: {}]   ;;  %s3776_s6 = inlined_call_operand.hbm [shape: f32[2,1,128], index: 6, kind: input, shape index: {}]   ;;  %s3777_s7 = inlined_call_operand.hbm [shape: bf16[2,128,384], index: 7, kind: input, shape index: {}]   ;;  %s3778_s8 = inlined_call_operand.vmem [shape: f32[2,1,384], index: 8, kind: input, shape index: {}]   ;;  %s3779_s9 = inlined_call_operand.hbm [shape: bf16[2,3,128,128], index: 9, kind: input, shape index: {}]   ;;  %s3780_s10 = inlined_call_operand.vmem [shape: f32[2,3,1,128], index: 10, kind: input, shape index: {}]   ;;  %s3781_s11 = inlined_call_operand.hbm [shape: f32[2,8,384], index: 11, kind: output, shape index: {}]  }
   0x1   :  { %3804 = sst [smem:[#allocation34_spill]] %s3771_s1 }
   0x2   :  { %3805 = sst [smem:[#allocation35_spill]] %s3773_s3 }
   0x3   :  { %3806 = sst [smem:[#allocation36_spill]] %s3778_s8 }
   0x4   :  { %3807 = sst [smem:[#allocation37_spill]] %s3780_s10 }
   0x5   :  { %3808 = sst [smem:[#allocation38_spill]] %s3781_s11 }
   0x6   :  { %16 = vsyncpa [#allocation3], 0 }
   0x7   :  { %18 = vsyncpa [#allocation3 + $0x1], 0 }
   0x8   :  { %19 = vsyncpa [#allocation6], 0 }
   0x9   :  { %21 = vsyncpa [#allocation6 + $0x1], 0 }
   0xa   :  { %22 = vsyncpa [#allocation9], 0 }
   0xb   :  { %24 = vsyncpa [#allocation9 + $0x1], 0 }
   0xc   :  { %25 = vsyncpa [#allocation12], 0 }
   0xd   :  { %27 = vsyncpa [#allocation12 + $0x1], 0 }
   0xe   :  { %28 = vsyncpa [#allocation15], 0 }
   0xf   :  { %30 = vsyncpa [#allocation15 + $0x1], 0 }
  0x10   :  { %31 = vsyncpa [#allocation4], 0 }
  0x11   :  { %33 = vsyncpa [#allocation4 + $0x1], 0  ;;  %s3250_s17 = smov 0   ;;  %s3252_s18 = smov 0  }
  0x12   :  { %s3254_s19 = smov 0   ;;  %s3256_s20 = smov 0  }
  0x13   :  { %s3258_s21 = smov 0   ;;  %s3260_s22 = smov 0  }
  0x14 LB: > { %3809 = sst [smem:[#allocation24_spill]] %s3149_s17  ;;  %s3281_s23 = sadd.s32 4294967295, %s3169_s22   ;;  %s3169_s22 = sphi %s3260_s22, %s39_s22   ;;  %s3165_s21 = sphi %s3258_s21, %s3854_s21   ;;  %s3161_s20 = sphi %s3256_s20, %s3853_s20   ;;  %s3157_s19 = sphi %s3254_s19, %s3852_s19   ;;  %s3153_s18 = sphi %s3252_s18, %s3851_s18   ;;  %s3149_s17 = sphi %s3250_s17, %s3850_s17  }
  0x15   : > { %3810 = sst [smem:[#allocation25_spill]] %s3157_s19  ;;  %s2232_s24 = sadd.s32 4294967294, %s3169_s22  }
  0x16   : > { %3811 = sst [smem:[#allocation26_spill]] %s3161_s20  ;;  %s51_s25 = sadd.s32 1, %s3165_s21 }
  0x17   : > { %3812 = sst [smem:[#allocation27_spill]] %s3169_s22  ;;  %s60_s26 = sadd.s32 1, %s3157_s19 }
  0x18   : > { %3813 = sst [smem:[#allocation28_spill]] %s3281_s23  ;;  %p53_p0 = scmp.ge.s32.totalorder %s51_s25, 2 }
  0x19   : > { %p67_p1 = scmp.ne.s32.totalorder %s3157_s19, %s3153_s18  ;;  %p68_p2 = scmp.eq.s32.totalorder %s3169_s22, 0 }
  0x1a   : > { %p73_p3 = scmp.ne.s32.totalorder %s3153_s18, %s3149_s17  ;;  %s3856_s25 = smov (%p53_p0, %s51_s25), 0 }
  0x1b   : > { %3814 = sst [smem:[#allocation29_spill]] %s3856_s25  ;;  %p3293_p4 = por %p68_p2, %p67_p1 }
  0x1c   : > { %p74_p5 = scmp.eq.s32.totalorder %s3281_s23, 0  ;;  %s55_s28 = ssub.s32 %s3165_s21, %s3856_s25 }
  0x1d   : > { %p359_p6 = scmp.eq.s32.totalorder %s3281_s23, 1  ;;  %p58_p7 = scmp.eq.s32.totalorder %s55_s28, 0 }
  0x1e   : > { %p3301_p8 = por %p74_p5, %p73_p3  ;;  %p365_p10 = scmp.eq.s32.totalorder %s2232_s24, 1 }
  0x1f   : > { %p3305_p9 = por %p359_p6, %p67_p1  ;;  %p2234_p12 = scmp.ge.s32.totalorder %s3169_s22, 2 }
  0x20   : > { %s3816_s29 = scalar_select %p3301_p8, 1, 0 }
  0x21   : > { %s3818_s30 = scalar_select %p3305_p9, 1, 0 }
  0x22   : > { %3817 = sst [smem:[#allocation30_spill]] %s3816_s29  ;;  %p3312_p11 = por %p365_p10, %p73_p3 }
  0x23   : > { %3819 = sst [smem:[#allocation31_spill]] %s3818_s30  ;;  %p2618_p13 = scmp.lt.s32.totalorder %s3169_s22, 2 }
  0x24   : > { %s3310_s12 = scalar_select %p58_p7, %s3157_s19, %s60_s26  }
  0x25   : > { %s3821_s13 = scalar_select %p3312_p11, 1, 0 }
  0x26   : > { %3820 = sst [smem:[#allocation32_spill]] %s3310_s12  ;;  %s3319_s14 = sand.u32 1, %s3157_s19  }
  0x27   : > { %3822 = sst [smem:[#allocation33_spill]] %s3821_s13  ;;  %s3322_s15 = sand.u32 1, %s3169_s22  }
  0x28   : > { %s3789_s16 = sshll.u32 %s3319_s14, 7  ;;  %p3327_p0 = pnand %p2618_p13, %p3293_p4 }
  0x29   : > { %s3790_s24 = sshll.u32 %s3165_s21, 11  ;;  %s3824_s1 = sld [smem:[#allocation34_spill]] }
  0x2a   : > { %s408_s19 = scalar_lea.vmem [#allocation5], %s3789_s16  ;;  %s3793_s17 = scalar_lea.sflag [#allocation6], %s3322_s15 }
  0x2b   : > { %s415_s13 = sshll.u32 %s408_s19, 4  ;;  %p3342_p1 = pneg %p3327_p0  ;;  %s416_s13 = int_to_ptr.vmem [resolvable:$true] %s415_s13 }
  0x2c   : > { %s2834_s27 = scalar_lea.vmem %s416_s13, 2048  ;;  %s3171_s30 = smov [#allocation5]  }
  0x2d   : > { %p2835_p2 = scmp.ne.s32.totalorder %s416_s13, %s2834_s27  ;;  %s2839_s10 = sshll.u32 %s3171_s30, 4  ;;  %s2840_s10 = int_to_ptr.vmem [resolvable:$false] %s2839_s10 }
  0x2e   : > { %s2841_s25 = scalar_lea.vmem %s2840_s10, 4096  ;;  %p2842_p5 = scmp.lt.s32.totalorder %s416_s13, %s2840_s10 }
  0x2f   : > { %s414_s12 = scalar_lea.hbm %s3824_s1, %s3790_s24  ;;  %p2837_p3 = pnand %p2835_p2, %p3342_p1 }
  0x30   : > { %p2843_p6 = scmp.lt.s32.totalorder %s2841_s25, %s2834_s27 }
  0x31   : > { %p2838_p4 = pneg %p2837_p3 }
  0x32   : > { %p2844_p7 = por %p2843_p6, %p2842_p5 }
  0x34   : > { %p2845_p10 = pnand %p2844_p7, %p2838_p4 }
  0x36   : > { %2848 = shalt.err (!%p2845_p10)
}
  0x37   : > { %s3172_s19 = smov 128   ;;  %s3173_s26 = smov 8  }
  0x38   : > { %2592 = dma.hbm_to_vmem [thread:$0]  (!%p3327_p0), %s414_s12, 2048, %s416_s13, %s3793_s17, %s3172_s19, %s3172_s19, %s3173_s26  }
  0x39   : > { %p2255_p13 = scmp.ge.s32.totalorder %s3169_s22, 1  ;;  %p576_p2 = scmp.lt.s32.totalorder %s3169_s22, 3 }
  0x3a   : > { %s2243_s10 = sshll.u32 %s3319_s14, 8  ;;  %s2417_s27 = sshll.u32 %s3165_s21, 12 }
  0x3b   : > { %p3358_p3 = pnand %p2255_p13, %p576_p2  ;;  %s448_s25 = scalar_lea.vmem [#allocation8], %s2243_s10 }
  0x3c   : > { %s455_s16 = sshll.u32 %s448_s25, 4  ;;  %s3827_s3 = sld [smem:[#allocation35_spill]]  ;;  %s456_s16 = int_to_ptr.vmem [resolvable:$true] %s455_s16 }
  0x3d   : > { %s3803_s20 = scalar_lea.sflag [#allocation9], %s3322_s15  ;;  %s2862_s23 = scalar_lea.vmem %s456_s16, 4096 }
  0x3e   : > { %p2863_p4 = scmp.ne.s32.totalorder %s456_s16, %s2862_s23  ;;  %s3174_s12 = smov [#allocation8]  }
  0x3f   : > { %s2867_s13 = sshll.u32 %s3174_s12, 4  ;;  %s2868_s13 = int_to_ptr.vmem [resolvable:$false] %s2867_s13 }
  0x40   : > { %p2865_p5 = pnand %p2863_p4, %p3342_p1  ;;  %s2869_s17 = scalar_lea.vmem %s2868_s13, 8192 }
  0x41   : > { %p2870_p7 = scmp.lt.s32.totalorder %s456_s16, %s2868_s13  ;;  %p2871_p10 = scmp.lt.s32.totalorder %s2869_s17, %s2862_s23 }
  0x42   : > { %s454_s8 = scalar_lea.hbm %s3827_s3, %s2417_s27  ;;  %p2866_p6 = pneg %p2865_p5 }
  0x43   : > { %p2872_p13 = por %p2871_p10, %p2870_p7 }
  0x45   : > { %p2873_p2 = pnand %p2872_p13, %p2866_p6 }
  0x47   : > { %2876 = shalt.err (!%p2873_p2)
}
  0x48   : > { %2598 = dma.hbm_to_vmem [thread:$0]  (!%p3327_p0), %s454_s8, 4096, %s456_s16, %s3803_s20, %s3172_s19, %s3172_s19, %s3173_s26  }
  0x49   : > { %s3828_s1 = sshll.u32 %s3165_s21, 11  ;;  %s3829_s23 = sshll.u32 %s3319_s14, 7 }
  0x4a   : > { %s494_s17 = scalar_lea.hbm %s3775_s5, %s3828_s1  ;;  %s488_s27 = scalar_lea.vmem [#allocation11], %s3829_s23 }
  0x4b   : > { %s495_s25 = sshll.u32 %s488_s27, 4  ;;  %s3802_s12 = scalar_lea.sflag [#allocation12], %s3322_s15  ;;  %s496_s25 = int_to_ptr.vmem [resolvable:$true] %s495_s25 }
  0x4c   : > { %s2890_s13 = scalar_lea.vmem %s496_s25, 2048  ;;  %s3175_s3 = smov [#allocation11]  }
  0x4d   : > { %p2891_p4 = scmp.ne.s32.totalorder %s496_s25, %s2890_s13  ;;  %s2895_s22 = sshll.u32 %s3175_s3, 4  ;;  %s2896_s22 = int_to_ptr.vmem [resolvable:$false] %s2895_s22 }
  0x4e   : > { %s2897_s29 = scalar_lea.vmem %s2896_s22, 4096  ;;  %p2898_p7 = scmp.lt.s32.totalorder %s496_s25, %s2896_s22 }
  0x4f   : > { %p2893_p5 = pnand %p2891_p4, %p3342_p1  ;;  %p2899_p10 = scmp.lt.s32.totalorder %s2897_s29, %s2890_s13 }
  0x51   : > { %p2894_p6 = pneg %p2893_p5  ;;  %p2900_p13 = por %p2899_p10, %p2898_p7 }
  0x53   : > { %p2901_p2 = pnand %p2900_p13, %p2894_p6 }
  0x55   : > { %2904 = shalt.err (!%p2901_p2)
}
  0x56   : > { %s3798_s8 = smov 64   ;;  %s3799_s16 = smov 4  }
  0x57   : > { %2604 = dma.hbm_to_vmem [thread:$0]  (!%p3327_p0), %s494_s17, 2048, %s496_s25, %s3802_s12, %s3798_s8, %s3798_s8, %s3799_s16  }
  0x58   : > { %s3800_s3 = smul.u32 192, %s3319_s14  ;;  %s523_s10 = scalar_lea.sflag [#allocation15], %s3322_s15 }
  0x59   : > { %s3801_s22 = smul.u32 3072, %s3165_s21  ;;  %s3178_s27 = smov [#allocation14]  }
  0x5a   : > { %s526_s1 = scalar_lea.vmem [#allocation14], %s3800_s3  ;;  %s2923_s13 = sshll.u32 %s3178_s27, 4  ;;  %s2924_s13 = int_to_ptr.vmem [resolvable:$false] %s2923_s13 }
  0x5b   : > { %s532_s26 = scalar_lea.hbm %s3777_s7, %s3801_s22  ;;  %s533_s24 = sshll.u32 %s526_s1, 4  ;;  %s534_s24 = int_to_ptr.vmem [resolvable:$true] %s533_s24 }
  0x5c   : > { %s2918_s23 = scalar_lea.vmem %s534_s24, 3072  ;;  %s2925_s17 = scalar_lea.vmem %s2924_s13, 6144 }
  0x5d   : > { %p2919_p4 = scmp.ne.s32.totalorder %s534_s24, %s2918_s23  ;;  %p2926_p7 = scmp.lt.s32.totalorder %s534_s24, %s2924_s13 }
  0x5e   : > { %p2927_p10 = scmp.lt.s32.totalorder %s2925_s17, %s2918_s23 }
  0x5f   : > { %p2921_p5 = pnand %p2919_p4, %p3342_p1 }
  0x60   : > { %p2928_p13 = por %p2927_p10, %p2926_p7 }
  0x61   : > { %p2922_p6 = pneg %p2921_p5 }
  0x63   : > { %p2929_p2 = pnand %p2928_p13, %p2922_p6 }
  0x65   : > { %2932 = shalt.err (!%p2929_p2)
}
  0x66   : > { %s3179_s25 = smov 192   ;;  %s3180_s29 = smov 12  }
  0x67   : > { %2610 = dma.hbm_to_vmem [thread:$0]  (!%p3327_p0), %s532_s26, 3072, %s534_s24, %s523_s10, %s3179_s25, %s3179_s25, %s3180_s29  }
  0x68   : > { %s2235_s19 = sshll.u32 %s3319_s14, 3  ;;  %s2236_s1 = sshll.u32 %s3165_s21, 7 }
  0x69   : > { %s395_s23 = scalar_lea.hbm %s3770_s0, %s2236_s1  ;;  %s389_s17 = scalar_lea.vmem [#allocation2], %s2235_s19 }
  0x6a   : > { %s397_s8 = sshll.u32 %s389_s17, 4  ;;  %s2240_s16 = sshll.u32 %s3319_s14, 1  ;;  %s398_s8 = int_to_ptr.vmem [resolvable:$true] %s397_s8 }
  0x6b   : > { %s386_s3 = scalar_lea.sflag [#allocation3], %s3319_s14  ;;  %s2946_s22 = scalar_lea.vmem %s398_s8, 128 }
  0x6c   : > { %p2947_p4 = scmp.ne.s32.totalorder %s398_s8, %s2946_s22  ;;  %s3181_s12 = smov [#allocation2]  }
  0x6d   : > { %s2951_s20 = sshll.u32 %s3181_s12, 4  ;;  %s2952_s20 = int_to_ptr.vmem [resolvable:$false] %s2951_s20 }
  0x6e   : > { %p2949_p5 = pnand %p2947_p4, %p3342_p1  ;;  %s2953_s26 = scalar_lea.vmem %s2952_s20, 256 }
  0x6f   : > { %p2954_p7 = scmp.lt.s32.totalorder %s398_s8, %s2952_s20  ;;  %p2955_p10 = scmp.lt.s32.totalorder %s2953_s26, %s2946_s22 }
  0x70   : > { %p2950_p6 = pneg %p2949_p5 }
  0x71   : > { %p2956_p13 = por %p2955_p10, %p2954_p7 }
  0x73   : > { %p2957_p2 = pnand %p2956_p13, %p2950_p6 }
  0x75   : > { %2960 = shalt.err (!%p2957_p2)
}
  0x76   : > { %2589 = dma.hbm_to_vmem [thread:$0]  (!%p3327_p0), %s395_s23, 128, %s398_s8, %s386_s3  }
  0x77   : > { %s2416_s24 = sshll.u32 %s3165_s21, 5  ;;  %s429_s12 = scalar_lea.vmem [#allocation7], %s2240_s16 }
  0x78   : > { %s435_s19 = scalar_lea.hbm %s3772_s2, %s2416_s24  ;;  %s437_s1 = sshll.u32 %s429_s12, 4  ;;  %s438_s1 = int_to_ptr.vmem [resolvable:$true] %s437_s1 }
  0x79   : > { %s2974_s20 = scalar_lea.vmem %s438_s1, 32  ;;  %s3182_s22 = smov [#allocation7]  }
  0x7a   : > { %p2975_p4 = scmp.ne.s32.totalorder %s438_s1, %s2974_s20  ;;  %s2979_s27 = sshll.u32 %s3182_s22, 4  ;;  %s2980_s27 = int_to_ptr.vmem [resolvable:$false] %s2979_s27 }
  0x7b   : > { %s2981_s13 = scalar_lea.vmem %s2980_s27, 64  ;;  %p2982_p7 = scmp.lt.s32.totalorder %s438_s1, %s2980_s27 }
  0x7c   : > { %p2977_p5 = pnand %p2975_p4, %p3342_p1  ;;  %p2983_p10 = scmp.lt.s32.totalorder %s2981_s13, %s2974_s20 }
  0x7e   : > { %p2978_p6 = pneg %p2977_p5  ;;  %p2984_p13 = por %p2983_p10, %p2982_p7 }
  0x80   : > { %p2985_p2 = pnand %p2984_p13, %p2978_p6 }
  0x82   : > { %2988 = shalt.err (!%p2985_p2)
}
  0x83   : > { %s3830_s8 = scalar_lea.sflag [#allocation6], %s3322_s15  ;;  %s475_s17 = scalar_lea.hbm %s3774_s4, %s2416_s24 }
  0x84   : > { %2595 = dma.hbm_to_vmem [thread:$0]  (!%p3327_p0), %s435_s19, 32, %s438_s1, %s3830_s8  }
  0x85   : > { %s469_s26 = scalar_lea.vmem [#allocation10], %s2240_s16  ;;  %s3183_s12 = smov [#allocation10]  }
  0x86   : > { %s477_s25 = sshll.u32 %s469_s26, 4  ;;  %s3007_s20 = sshll.u32 %s3183_s12, 4  ;;  %s478_s25 = int_to_ptr.vmem [resolvable:$true] %s477_s25  ;;  %s3008_s20 = int_to_ptr.vmem [resolvable:$false] %s3007_s20 }
  0x87   : > { %s3002_s29 = scalar_lea.vmem %s478_s25, 32  ;;  %s3009_s22 = scalar_lea.vmem %s3008_s20, 64 }
  0x88   : > { %p3003_p4 = scmp.ne.s32.totalorder %s478_s25, %s3002_s29  ;;  %p3010_p7 = scmp.lt.s32.totalorder %s478_s25, %s3008_s20 }
  0x89   : > { %p3011_p10 = scmp.lt.s32.totalorder %s3009_s22, %s3002_s29 }
  0x8a   : > { %p3005_p5 = pnand %p3003_p4, %p3342_p1 }
  0x8b   : > { %p3012_p13 = por %p3011_p10, %p3010_p7 }
  0x8c   : > { %p3006_p6 = pneg %p3005_p5 }
  0x8e   : > { %p3013_p2 = pnand %p3012_p13, %p3006_p6 }
  0x90   : > { %3016 = shalt.err (!%p3013_p2)
}
  0x91   : > { %s3831_s16 = scalar_lea.sflag [#allocation9], %s3322_s15  ;;  %s2252_s24 = sshll.u32 %s3165_s21, 4 }
  0x92   : > { %2601 = dma.hbm_to_vmem [thread:$0]  (!%p3327_p0), %s475_s17, 32, %s478_s25, %s3831_s16  }
  0x93   : > { %s508_s19 = scalar_lea.vmem [#allocation13], %s3319_s14  ;;  %s513_s8 = scalar_lea.hbm %s3776_s6, %s2252_s24 }
  0x94   : > { %s515_s1 = sshll.u32 %s508_s19, 4  ;;  %s3184_s23 = smov [#allocation13]   ;;  %s516_s1 = int_to_ptr.vmem [resolvable:$true] %s515_s1 }
  0x95   : > { %s3030_s3 = scalar_lea.vmem %s516_s1, 16  ;;  %s3035_s26 = sshll.u32 %s3184_s23, 4  ;;  %s3036_s26 = int_to_ptr.vmem [resolvable:$false] %s3035_s26 }
  0x96   : > { %p3031_p4 = scmp.ne.s32.totalorder %s516_s1, %s3030_s3  ;;  %s3037_s29 = scalar_lea.vmem %s3036_s26, 32 }
  0x97   : > { %p3038_p7 = scmp.lt.s32.totalorder %s516_s1, %s3036_s26  ;;  %p3039_p10 = scmp.lt.s32.totalorder %s3037_s29, %s3030_s3 }
  0x98   : > { %p3033_p5 = pnand %p3031_p4, %p3342_p1 }
  0x99   : > { %p3040_p13 = por %p3039_p10, %p3038_p7 }
  0x9a   : > { %p3034_p6 = pneg %p3033_p5 }
  0x9c   : > { %p3041_p2 = pnand %p3040_p13, %p3034_p6 }
  0x9e   : > { %3044 = shalt.err (!%p3041_p2)
}
  0x9f   : > { %s3832_s17 = scalar_lea.sflag [#allocation12], %s3322_s15  ;;  %s3833_s25 = smul.u32 3072, %s3165_s21 }
  0xa0   : > { %2607 = dma.hbm_to_vmem [thread:$0]  (!%p3327_p0), %s513_s8, 16, %s516_s1, %s3832_s17  }
  0xa1   : > { %s560_s22 = scalar_lea.hbm %s3779_s9, %s3833_s25  ;;  %s3834_s16 = smul.u32 192, %s3319_s14 }
  0xa2   : > { %s3185_s13 = smov [#allocation16]  }
  0xa3   : > { %s554_s24 = scalar_lea.vmem [#allocation16], %s3834_s16  ;;  %s3063_s3 = sshll.u32 %s3185_s13, 4  ;;  %s3064_s3 = int_to_ptr.vmem [resolvable:$false] %s3063_s3 }
  0xa4   : > { %s561_s19 = sshll.u32 %s554_s24, 4  ;;  %s3065_s23 = scalar_lea.vmem %s3064_s3, 6144  ;;  %s562_s19 = int_to_ptr.vmem [resolvable:$true] %s561_s19 }
  0xa5   : > { %s3058_s27 = scalar_lea.vmem %s562_s19, 3072  ;;  %p3066_p7 = scmp.lt.s32.totalorder %s562_s19, %s3064_s3 }
  0xa6   : > { %p3059_p4 = scmp.ne.s32.totalorder %s562_s19, %s3058_s27  ;;  %p3067_p10 = scmp.lt.s32.totalorder %s3065_s23, %s3058_s27 }
  0xa8   : > { %p3061_p5 = pnand %p3059_p4, %p3342_p1  ;;  %p3068_p13 = por %p3067_p10, %p3066_p7 }
  0xaa   : > { %p3062_p6 = pneg %p3061_p5 }
  0xac   : > { %p3069_p2 = pnand %p3068_p13, %p3062_p6 }
  0xae   : > { %3072 = shalt.err (!%p3069_p2)
}
  0xaf   : > { %s3835_s14 = smov 4   ;;  %s3836_s1 = smov 64  }
  0xb0   : > { %2613 = dma.hbm_to_vmem [thread:$0]  (!%p3327_p0), %s560_s22, 3072, %s562_s19, %s523_s10, %s3836_s1, %s3836_s1, %s3835_s14  }
  0xb1   : > { %580 = sbr.rel (%p3358_p3) target bundleno = 1285 (0x505), region = 64  ;;  %s3473_s8 = sand.u32 (!%p3358_p3), 1, %s3153_s18  }
  0xb2   : > { %s2256_s26 = sshll.u32 (!%p3358_p3), %s3473_s8, 3  ;;  %s583_s29 = scalar_lea.sflag (!%p3358_p3), [#allocation3], %s3473_s8 }
  0xb3   : > { %s3477_s17 = scalar_lea.vmem (!%p3358_p3), [#allocation2], %s2256_s26 }
  0xb6   : > { %3124 = dma.done.wait (%p3301_p8), %s583_s29, 128  }
  0xb7   : > { %3126 = vsyncadd (%p3301_p8), %s583_s29, 4294967168  ;;  %s3838_s15 = sld [smem:[#allocation28_spill]]  ;;  %s2257_s30 = sshll.u32 %s3473_s8, 7 }
  0xb8   : > { %s3485_s25 = scalar_lea.vmem [#allocation5], %s2257_s30 }
  0xbd   : > { %s591_s28 = sand.u32 1, %s3838_s15  }
  0xbe   : > { %s592_s10 = scalar_lea.sflag [#allocation6], %s591_s28 }
  0xbf   : > { %3128 = dma.done.wait (%p3301_p8), %s592_s10, 2080  }
  0xc0   : > { %3130 = vsyncadd (%p3301_p8), %s592_s10, 4294965216  ;;  %s2258_s12 = sshll.u32 %s3473_s8, 1  ;;  %s2259_s20 = sshll.u32 %s3473_s8, 8 }
  0xc1   : > { %s3493_s22 = scalar_lea.vmem [#allocation7], %s2258_s12  ;;  %s610_s16 = scalar_lea.sflag [#allocation9], %s591_s28 }
  0xc2   : > { %s3495_s24 = scalar_lea.vmem [#allocation8], %s2259_s20 }
  0xc3   : > { %3132 = dma.done.wait (%p3301_p8), %s610_s16, 4128  }
  0xc4   : > { %3134 = vsyncadd (%p3301_p8), %s610_s16, 4294963168  ;;  %s3501_s19 = scalar_lea.vmem [#allocation10], %s2258_s12  ;;  %s628_s27 = scalar_lea.sflag [#allocation12], %s591_s28 }
  0xc5   : > { %s3503_s13 = scalar_lea.vmem [#allocation11], %s2257_s30 }
  0xc6   : > { %3136 = dma.done.wait (%p3301_p8), %s628_s27, 2064  }
  0xc7   : > { %3138 = vsyncadd (%p3301_p8), %s628_s27, 4294965232  ;;  %s2562_s3 = smul.u32 192, %s3473_s8  ;;  %s639_s23 = scalar_lea.vmem [#allocation13], %s3473_s8 }
  0xc8   : > { %s645_s14 = scalar_lea.sflag [#allocation15], %s591_s28 }
  0xc9   : > { %s3513_s1 = scalar_lea.vmem [#allocation14], %s2562_s3 }
  0xca   : > { %3140 = dma.done.wait (%p3301_p8), %s645_s14, 6144  }
  0xcb   : > { %3142 = vsyncadd (%p3301_p8), %s645_s14, 4294961152  ;;  %v3186_v0 = vmov 0   ;;  %v2677_v1 = vld [vmem:[%s3485_s25 + $0x74] ss:$8 sps:$4 sm:$0xff]   ;;  %v2679_v2 = vld [vmem:[%s3485_s25 + $0x70] ss:$8 sps:$4 sm:$0xff]   ;;  %v772_v63 = vlaneseq }
  0xcc   : > { %894 = vmatprep.mubr.bf16.mxu0 %v3186_v0  ;;  %862 = vmatprep.subr.bf16.mxu0 %v2677_v1  ;;  %v2680_v3 = vld [vmem:[%s3485_s25 + $0x64] ss:$8 sps:$4 sm:$0xff]   ;;  %v2682_v4 = vld [vmem:[%s3485_s25 + $0x60] ss:$8 sps:$4 sm:$0xff]   ;;  %v2683_v5 = vld [vmem:[%s3485_s25 + $0x54] ss:$8 sps:$4 sm:$0xff]  }
  0xcd   : > { %863 = vmatpush1.bf16.msra.mxu0 %v2679_v2  ;;  %v2685_v6 = vld [vmem:[%s3485_s25 + $0x50] ss:$8 sps:$4 sm:$0xff]   ;;  %v2686_v7 = vld [vmem:[%s3485_s25 + $0x44] ss:$8 sps:$4 sm:$0xff]   ;;  %v2688_v8 = vld [vmem:[%s3485_s25 + $0x40] ss:$8 sps:$4 sm:$0xff]  }
  0xce   : > { %864 = vmatprep.subr.bf16.mxu0 %v2680_v3  ;;  %v2689_v9 = vld [vmem:[%s3485_s25 + $0x34] ss:$8 sps:$4 sm:$0xff]   ;;  %v2701_v10 = vld [vmem:[%s3495_s24 + $0x74] ss:$8 sps:$4 sm:$0xff]   ;;  %v2704_v12 = vld [vmem:[%s3495_s24 + $0x64] ss:$8 sps:$4 sm:$0xff]  }
  0xcf   : > { %v2703_v11 = vld [vmem:[%s3495_s24 + $0x70] ss:$8 sps:$4 sm:$0xff]   ;;  %1111 = vmatprep.subr.bf16.mxu1 %v2701_v10  ;;  %v2691_v13 = vld [vmem:[%s3485_s25 + $0x30] ss:$8 sps:$4 sm:$0xff]   ;;  %v2706_v14 = vld [vmem:[%s3495_s24 + $0x60] ss:$8 sps:$4 sm:$0xff]  }
  0xd0   : > { %1112 = vmatpush1.bf16.msra.mxu1 %v2703_v11  ;;  %v2707_v15 = vld [vmem:[%s3495_s24 + $0x54] ss:$8 sps:$4 sm:$0xff]   ;;  %v2692_v16 = vld [vmem:[%s3485_s25 + $0x24] ss:$8 sps:$4 sm:$0xff]   ;;  %v2709_v18 = vld [vmem:[%s3495_s24 + $0x50] ss:$8 sps:$4 sm:$0xff]  }
  0xd1   : > { %865 = vmatpush1.bf16.msra.mxu0 %v2682_v4  ;;  %1113 = vmatprep.subr.bf16.mxu1 %v2704_v12  ;;  %v2694_v17 = vld [vmem:[%s3485_s25 + $0x20] ss:$8 sps:$4 sm:$0xff]   ;;  %v2695_v20 = vld [vmem:[%s3485_s25 + $0x14] ss:$8 sps:$4 sm:$0xff]   ;;  %v2697_v21 = vld [vmem:[%s3485_s25 + $0x10] ss:$8 sps:$4 sm:$0xff]  }
  0xd2   : > { %866 = vmatprep.subr.bf16.mxu0 %v2683_v5  ;;  %v2710_v19 = vld [vmem:[%s3495_s24 + $0x44] ss:$8 sps:$4 sm:$0xff]   ;;  %v2712_v22 = vld [vmem:[%s3495_s24 + $0x40] ss:$8 sps:$4 sm:$0xff]   ;;  %v2713_v23 = vld [vmem:[%s3495_s24 + $0x34] ss:$8 sps:$4 sm:$0xff]  }
  0xd3   : > { %v2698_v24 = vld [vmem:[%s3485_s25 + $0x4] ss:$8 sps:$4 sm:$0xff]   ;;  %v2700_v25 = vld [vmem:[%s3485_s25] ss:$8 sps:$4 sm:$0xff]   ;;  %v3546_v26 = vld [vmem:[%s3477_s17] sm:$0xff]  ;;  %v3585_v1 = vshrl.u32 %v772_v63, 7 }
  0xd4   : > { %1114 = vmatpush1.bf16.msra.mxu1 %v2706_v14  ;;  %v2715_v27 = vld [vmem:[%s3495_s24 + $0x30] ss:$8 sps:$4 sm:$0xff]   ;;  %v2716_v28 = vld [vmem:[%s3495_s24 + $0x24] ss:$8 sps:$4 sm:$0xff]   ;;  %v2718_v29 = vld [vmem:[%s3495_s24 + $0x20] ss:$8 sps:$4 sm:$0xff]   ;;  %v770_v31 = vpack.c.bf16 %v3546_v26, %v3546_v26 }
  0xd5   : > { %867 = vmatpush1.bf16.msra.mxu0 %v2685_v6  ;;  %1115 = vmatprep.subr.bf16.mxu1 %v2707_v15  ;;  %v2719_v30 = vld [vmem:[%s3495_s24 + $0x14] ss:$8 sps:$4 sm:$0xff]   ;;  %v2721_v32 = vld [vmem:[%s3495_s24 + $0x10] ss:$8 sps:$4 sm:$0xff]   ;;  %v2722_v33 = vld [vmem:[%s3495_s24 + $0x4] ss:$8 sps:$4 sm:$0xff]  }
  0xd6   : > { %868 = vmatprep.subr.bf16.mxu0 %v2686_v7  ;;  %v2724_v34 = vld [vmem:[%s3495_s24] ss:$8 sps:$4 sm:$0xff]   ;;  %v2725_v35 = vld [vmem:[%s3495_s24 + $0xf4] ss:$8 sps:$4 sm:$0xff]   ;;  %v2727_v36 = vld [vmem:[%s3495_s24 + $0xf0] ss:$8 sps:$4 sm:$0xff]  }
  0xd7   : > { %v2728_v37 = vld [vmem:[%s3495_s24 + $0xe4] ss:$8 sps:$4 sm:$0xff]   ;;  %v2730_v38 = vld [vmem:[%s3495_s24 + $0xe0] ss:$8 sps:$4 sm:$0xff]   ;;  %v2731_v39 = vld [vmem:[%s3495_s24 + $0xd4] ss:$8 sps:$4 sm:$0xff]  }
  0xd8   : > { %1116 = vmatpush1.bf16.msra.mxu1 %v2709_v18  ;;  %v2733_v40 = vld [vmem:[%s3495_s24 + $0xd0] ss:$8 sps:$4 sm:$0xff]   ;;  %v2734_v41 = vld [vmem:[%s3495_s24 + $0xc4] ss:$8 sps:$4 sm:$0xff]   ;;  %v2736_v42 = vld [vmem:[%s3495_s24 + $0xc0] ss:$8 sps:$4 sm:$0xff]  }
  0xd9   : > { %869 = vmatpush1.bf16.msra.mxu0 %v2688_v8  ;;  %1117 = vmatprep.subr.bf16.mxu1 %v2710_v19  ;;  %v2737_v43 = vld [vmem:[%s3495_s24 + $0xb4] ss:$8 sps:$4 sm:$0xff]   ;;  %v2739_v44 = vld [vmem:[%s3495_s24 + $0xb0] ss:$8 sps:$4 sm:$0xff]   ;;  %v2740_v45 = vld [vmem:[%s3495_s24 + $0xa4] ss:$8 sps:$4 sm:$0xff]  }
  0xda   : > { %870 = vmatprep.subr.bf16.mxu0 %v2689_v9  ;;  %v2742_v46 = vld [vmem:[%s3495_s24 + $0xa0] ss:$8 sps:$4 sm:$0xff]   ;;  %v2743_v47 = vld [vmem:[%s3495_s24 + $0x94] ss:$8 sps:$4 sm:$0xff]   ;;  %v2745_v48 = vld [vmem:[%s3495_s24 + $0x90] ss:$8 sps:$4 sm:$0xff]  }
  0xdb   : > { %v2746_v49 = vld [vmem:[%s3495_s24 + $0x84] ss:$8 sps:$4 sm:$0xff]   ;;  %v2748_v50 = vld [vmem:[%s3495_s24 + $0x80] ss:$8 sps:$4 sm:$0xff]   ;;  %v2751_v53 = vld [vmem:[%s3503_s13 + $0x70] sm:$0xff]   ;;  %v3588_v2 = vsub.s32 0, %v3585_v1 }
  0xdc   : > { %1118 = vmatpush1.bf16.msra.mxu1 %v2712_v22  ;;  %v2749_v51 = vld [vmem:[%s3503_s13 + $0x78] sm:$0xff]   ;;  %v2752_v54 = vld [vmem:[%s3503_s13 + $0x30] sm:$0xff]   ;;  %v2753_v55 = vld [vmem:[%s3503_s13 + $0x68] sm:$0xff]   ;;  %v3592_v4 = vsub.s32 1, %v3585_v1  ;;  %v3187_v22 = vmov 0.0   ;;  %vm3188_vm0 = vmmov 0  }
  0xdd   : > { %871 = vmatpush1.bf16.msra.mxu0 %v2691_v13  ;;  %1119 = vmatprep.subr.bf16.mxu1 %v2713_v23  ;;  %v2750_v52 = vld [vmem:[%s3503_s13 + $0x38] sm:$0xff]   ;;  %v2754_v56 = vld [vmem:[%s3503_s13 + $0x28] sm:$0xff]   ;;  %v2755_v57 = vld [vmem:[%s3503_s13 + $0x60] sm:$0xff]   ;;  %s3642_s11 = scalar_lea.vmem [#allocation16], %s2562_s3  ;;  %s3839_s26 = sld [smem:[#allocation26_spill]] }
  0xde   : > { %872 = vmatprep.subr.bf16.mxu0 %v2692_v16  ;;  %v2756_v58 = vld [vmem:[%s3503_s13 + $0x20] sm:$0xff]   ;;  %v2757_v59 = vld [vmem:[%s3503_s13 + $0x58] sm:$0xff]   ;;  %v2759_v61 = vld [vmem:[%s3503_s13 + $0x50] sm:$0xff]   ;;  %s3840_s30 = sld [smem:[#allocation36_spill]]  ;;  %s2563_s16 = smul.u32 24, %s3473_s8 }
  0xdf   : > { %v2758_v60 = vld [vmem:[%s3503_s13 + $0x18] sm:$0xff]   ;;  %v2760_v62 = vld [vmem:[%s3503_s13 + $0x10] sm:$0xff]   ;;  %v2762_v18 = vld [vmem:[%s3503_s13 + $0x8] sm:$0xff]   ;;  %s3841_s20 = sld [smem:[#allocation37_spill]] }
  0xe0   : > { %1120 = vmatpush1.bf16.msra.mxu1 %v2715_v27  ;;  %v769_v3 = vld [vmem:[%s3493_s22] sm:$0x3]  ;;  %v2763_v19 = vld [vmem:[%s3503_s13 + $0x40] sm:$0xff]   ;;  %s742_s24 = scalar_lea.vmem [#allocation17], %s2563_s16  ;;  %s3843_s14 = sld [smem:[#allocation38_spill]] }
  0xe1   : > { %873 = vmatpush1.bf16.msra.mxu0 %v2694_v17  ;;  %1121 = vmatprep.subr.bf16.mxu1 %v2716_v28  ;;  %v775_v5 = vrot.slane %v769_v3, %v3588_v2  ;;  %v779_v6 = vrot.slane %v769_v3, %v3592_v4  ;;  %v2761_v17 = vld [vmem:[%s3503_s13 + $0x48] sm:$0xff]   ;;  %v2768_v23 = vld [vmem:[%s3513_s1 + $0xb0] ss:$12 sps:$4 sm:$0xff]  }
  0xe2   : > { %874 = vmatprep.subr.bf16.mxu0 %v2695_v20  ;;  %v2764_v20 = vld [vmem:[%s3503_s13] sm:$0xff]   ;;  %v2780_v27 = vld [vmem:[%s3513_s1 + $0x68] ss:$12 sps:$4 sm:$0xff]   ;;  %s1956_s13 = sshll.u32 %s742_s24, 4  ;;  %s3724_s13 = int_to_ptr.vmem [resolvable:$true] %s1956_s13 }
  0xe3   : > { %v2784_v28 = vld [vmem:[%s3513_s1 + $0x50] ss:$12 sps:$4 sm:$0xff]   ;;  %p743_p8 = scmp.lt.s32.totalorder %s3839_s26, 1  ;;  %s2565_s27 = smul.u32 384, %s3839_s26 }
  0xe4   : > { %1122 = vmatpush1.bf16.msra.mxu1 %v2718_v29  ;;  %v937_v29 = vld [vmem:[%s3501_s19] sm:$0x3] }
  0xe5   : > { %875 = vmatpush1.bf16.msra.mxu0 %v2697_v21  ;;  %1123 = vmatprep.subr.bf16.mxu1 %v2719_v30  ;;  %v2767_v21 = vld [vmem:[%s3513_s1 + $0xac] ss:$12 sps:$4 sm:$0xff]   ;;  %v944_v30 = vrot.slane %v937_v29, %v3588_v2  ;;  %s3684_s29 = scalar_select %p743_p8, %s3839_s26, 1 }
  0xe6   : > { %876 = vmatprep.subr.bf16.mxu0 %v2698_v24  ;;  %v2772_v24 = vld [vmem:[%s3513_s1 + $0x98] ss:$12 sps:$4 sm:$0xff]   ;;  %s3073_s26 = scalar_lea.vmem %s3724_s13, 384 }
  0xe7   : > { %s2564_s17 = smul.u32 3, %s3684_s29  ;;  %p3074_p0 = scmp.ne.s32.totalorder %s3724_s13, %s3073_s26 }
  0xe8   : > { %1124 = vmatpush1.bf16.msra.mxu1 %v2721_v32  ;;  %s3189_s29 = smov [#allocation17]  }
  0xe9   : > { %877 = vmatpush1.bf16.msra.mxu0 %v2700_v25  ;;  %1125 = vmatprep.subr.bf16.mxu1 %v2722_v33  ;;  %v2776_v25 = vld [vmem:[%s3513_s1 + $0x80] ss:$12 sps:$4 sm:$0xff]   ;;  %s746_s10 = scalar_lea.vmem %s3840_s30, %s2564_s17  ;;  %s750_s22 = scalar_lea.vmem %s3841_s20, %s2564_s17 }
  0xea   : > { %2420 = vmatprep.subr.bf16.mxu0 %v2749_v51  ;;  %v2785_v51 = vld [vmem:[%s3513_s1 + $0x30] ss:$12 sps:$4 sm:$0xff]   ;;  %p3075_p1 = pnand %p3074_p0, %p3305_p9  ;;  %s3077_s17 = sshll.u32 %s3189_s29, 4  ;;  %s3078_s17 = int_to_ptr.vmem [resolvable:$false] %s3077_s17 }
  0xeb   : > { %s3079_s15 = scalar_lea.vmem %s3078_s17, 768  ;;  %p3080_p4 = scmp.lt.s32.totalorder %s3724_s13, %s3078_s17 }
  0xec   : > { %895 = vmatmul.mubr.bf16.vlgmr.msra.gmra.mxu0 %v770_v31  ;;  %1126 = vmatpush1.bf16.msra.mxu1 %v2724_v34  ;;  %v948_v31 = vrot.slane %v937_v29, %v3592_v4  ;;  %p3076_p3 = pneg %p3075_p1  ;;  %p3081_p5 = scmp.lt.s32.totalorder %s3079_s15, %s3073_s26 }
  0xed   : > { %1127 = vmatprep.subr.bf16.mxu1 %v2725_v35  ;;  %2421 = vmatpush3.bf16.msra.mxu0 %v2750_v52  ;;  %v2788_v52 = vld [vmem:[%s3513_s1 + $0x38] ss:$12 sps:$4 sm:$0xff]  }
  0xee   : > { %2422 = vmatprep.subr.bf16.mxu0 %v2751_v53  ;;  %v2791_v53 = vld [vmem:[%s3513_s1 + $0x1c] ss:$12 sps:$4 sm:$0xff]   ;;  %p3082_p6 = por %p3081_p5, %p3080_p4 }
  0xf0   : > { %1128 = vmatpush2.bf16.msra.mxu1 %v2727_v36  ;;  %p3083_p7 = pnand %p3082_p6, %p3076_p3 }
  0xf1   : > { %1129 = vmatprep.subr.bf16.mxu1 %v2728_v37  ;;  %2423 = vmatpush3.bf16.msra.mxu0 %v2752_v54  ;;  %v2789_v54 = vld [vmem:[%s3513_s1 + $0x18] ss:$12 sps:$4 sm:$0xff]  }
  0xf2   : > { %2424 = vmatprep.subr.bf16.mxu0 %v2753_v55  ;;  %v2792_v55 = vld [vmem:[%s3513_s1 + $0x20] ss:$12 sps:$4 sm:$0xff]  }
  0xf4   : > { %1130 = vmatpush2.bf16.msra.mxu1 %v2730_v38 }
  0xf5   : > { %1131 = vmatprep.subr.bf16.mxu1 %v2731_v39  ;;  %2425 = vmatpush3.bf16.msra.mxu0 %v2754_v56  ;;  %v2795_v56 = vld [vmem:[%s3513_s1 + $0x4] ss:$12 sps:$4 sm:$0xff]  }
  0xf6   : > { %2426 = vmatprep.subr.bf16.mxu0 %v2755_v57  ;;  %v2793_v57 = vld [vmem:[%s3513_s1] ss:$12 sps:$4 sm:$0xff]  }
  0xf8   : > { %1132 = vmatpush2.bf16.msra.mxu1 %v2733_v40 }
  0xf9   : > { %1133 = vmatprep.subr.bf16.mxu1 %v2734_v41  ;;  %2427 = vmatpush3.bf16.msra.mxu0 %v2756_v58  ;;  %v2765_v41 = vld [vmem:[%s3513_s1 + $0xa8] ss:$12 sps:$4 sm:$0xff]  }
  0xfa   : > { %2428 = vmatprep.subr.bf16.mxu0 %v2757_v59  ;;  %v2796_v58 = vld [vmem:[%s3513_s1 + $0x8] ss:$12 sps:$4 sm:$0xff]  }
  0xfc   : > { %1134 = vmatpush2.bf16.msra.mxu1 %v2736_v42 }
  0xfd   : > { %1135 = vmatprep.subr.bf16.mxu1 %v2737_v43  ;;  %2429 = vmatpush3.bf16.msra.mxu0 %v2758_v60  ;;  %v2771_v43 = vld [vmem:[%s3513_s1 + $0x94] ss:$12 sps:$4 sm:$0xff]   ;;  %v2310_v60 = vld [vmem:[%s639_s23] ss:$0 sm:$0xff] }
  0xfe   : > { %2430 = vmatprep.subr.bf16.mxu0 %v2759_v61 }
 0x100   : > { %1136 = vmatpush2.bf16.msra.mxu1 %v2739_v44  ;;  %v2769_v44 = vld [vmem:[%s3513_s1 + $0x90] ss:$12 sps:$4 sm:$0xff]  }
 0x101   : > { %1137 = vmatprep.subr.bf16.mxu1 %v2740_v45  ;;  %2431 = vmatpush3.bf16.msra.mxu0 %v2760_v62  ;;  %v2775_v45 = vld [vmem:[%s3513_s1 + $0x7c] ss:$12 sps:$4 sm:$0xff]  }
 0x102   : > { %2432 = vmatprep.subr.bf16.mxu0 %v2761_v17  ;;  %v2807_v17 = vld [vmem:[%s3642_s11 + $0x10] sm:$0xff]  }
 0x104   : > { %1138 = vmatpush2.bf16.msra.mxu1 %v2742_v46  ;;  %v2773_v46 = vld [vmem:[%s3513_s1 + $0x78] ss:$12 sps:$4 sm:$0xff]  }
 0x105   : > { %1139 = vmatprep.subr.bf16.mxu1 %v2743_v47  ;;  %2433 = vmatpush3.bf16.msra.mxu0 %v2762_v18  ;;  %v2779_v47 = vld [vmem:[%s3513_s1 + $0x64] ss:$12 sps:$4 sm:$0xff]  }
 0x106   : > { %2434 = vmatprep.subr.bf16.mxu0 %v2763_v19  ;;  %v2808_v18 = vld [vmem:[%s3642_s11 + $0x50] sm:$0xff]   ;;  %v2809_v19 = vld [vmem:[%s3642_s11 + $0x8] sm:$0xff]  }
 0x108   : > { %1140 = vmatpush2.bf16.msra.mxu1 %v2745_v48  ;;  %v2777_v48 = vld [vmem:[%s3513_s1 + $0x60] ss:$12 sps:$4 sm:$0xff]  }
 0x109   : > { %1141 = vmatprep.subr.bf16.mxu1 %v2746_v49  ;;  %2435 = vmatpush3.bf16.msra.mxu0 %v2764_v20  ;;  %v2783_v49 = vld [vmem:[%s3513_s1 + $0x4c] ss:$12 sps:$4 sm:$0xff]  }
 0x10a   : > { %1510 = vmatprep.subr.bf16.mxu0 %v2767_v21  ;;  %v2810_v20 = vld [vmem:[%s3642_s11 + $0x48] sm:$0xff]   ;;  %v2811_v21 = vld [vmem:[%s3642_s11] sm:$0xff]  }
 0x10c   : > { %1142 = vmatpush2.bf16.msra.mxu1 %v2748_v50  ;;  %v2781_v50 = vld [vmem:[%s3513_s1 + $0x48] ss:$12 sps:$4 sm:$0xff]  }
 0x10d   : > { %2478 = vmatprep.subr.bf16.mxu1 %v3187_v22 }
 0x1ac   : > { %v896_v7 = vpop.f32.mrf.mxu0 }
 0x1ad   : > { %v897_v8 = vadd.f32 %v896_v7, %v775_v5  ;;  %v2797_v7 = vld [vmem:[%s3642_s11 + $0x38] sm:$0xff]  }
 0x1ae   : > { %v898_v9 = vpop.f32.mrf.mxu0 }
 0x1af   : > { %v899_v10 = vadd.f32 %v898_v9, %v779_v6  ;;  %v903_v11 = vmax.f32 %v897_v8, 0.0  ;;  %v2798_v8 = vld [vmem:[%s3642_s11 + $0x78] sm:$0xff]  }
 0x1b0   : > { %v900_v12 = vpop.f32.mrf.mxu0 }
 0x1b1   : > { %v904_v13 = vmax.f32 %v899_v10, 0.0  ;;  %v938_v16 = vpack.c.bf16 %v903_v11, %v903_v11  ;;  %v2799_v10 = vld [vmem:[%s3642_s11 + $0x30] sm:$0xff]   ;;  %v2802_v12 = vld [vmem:[%s3642_s11 + $0x68] sm:$0xff]  }
 0x1b2   : > { %v901_v14 = vpop.f32.mrf.mxu0  ;;  %v2800_v11 = vld [vmem:[%s3642_s11 + $0x70] sm:$0xff]  }
 0x1b3   : > { %v939_v15 = vpack.c.bf16 %v904_v13, %v904_v13  ;;  %v2803_v13 = vld [vmem:[%s3642_s11 + $0x20] sm:$0xff]  }
 0x1b4   : > { %v2804_v14 = vld [vmem:[%s3642_s11 + $0x60] sm:$0xff]  }
 0x1b5   : > { %1143 = vmatprep.mubr.bf16.mxu1 %v939_v15  ;;  %v2805_v15 = vld [vmem:[%s3642_s11 + $0x18] sm:$0xff]  }
 0x1b6   : > { %1144 = vmatmul.mubr.bf16.vlgmr.msra.gmra.mxu1 %v938_v16  ;;  %v2806_v16 = vld [vmem:[%s3642_s11 + $0x58] sm:$0xff]  }
 0x1b7   : > { %2479 = vmatpush3.bf16.msra.mxu1 %v2768_v23  ;;  %2494 = vmatprep.mubr.msk.bf16.mxu1 %vm3188_vm0, %v3187_v22  ;;  %v2812_v23 = vld [vmem:[%s3642_s11 + $0x40] sm:$0xff]  }
 0x1b8   : > { %2480 = vmatprep.subr.bf16.mxu1 %v3187_v22 }
 0x1bb   : > { %2481 = vmatpush3.bf16.msra.mxu1 %v2772_v24  ;;  %v1364_v24 = vld [vmem:[%s746_s10] sm:$0x7] }
 0x1bc   : > { %2482 = vmatprep.subr.bf16.mxu1 %v3187_v22 }
 0x1bf   : > { %2483 = vmatpush3.bf16.msra.mxu1 %v2776_v25  ;;  %v1370_v25 = vrot.slane %v1364_v24, %v3588_v2 }
 0x1c0   : > { %2484 = vmatprep.subr.bf16.mxu1 %v3187_v22 }
 0x1c3   : > { %2485 = vmatpush3.bf16.msra.mxu1 %v2780_v27  ;;  %v1374_v27 = vrot.slane %v1364_v24, %v3592_v4  ;;  %v2814_v4 = vld [vmem:[%s3642_s11 + $0xb0] sm:$0xff]  }
 0x1c4   : > { %2486 = vmatprep.subr.bf16.mxu1 %v3187_v22 }
 0x1c7   : > { %2487 = vmatpush3.bf16.msra.mxu1 %v2784_v28 }
 0x1c8   : > { %2488 = vmatprep.subr.bf16.mxu1 %v3187_v22 }
 0x1cb   : > { %2489 = vmatpush3.bf16.msra.mxu1 %v2788_v52 }
 0x1cc   : > { %2490 = vmatprep.subr.bf16.mxu1 %v3187_v22 }
 0x1cf   : > { %2491 = vmatpush3.bf16.msra.mxu1 %v2792_v55 }
 0x1d0   : > { %2492 = vmatprep.subr.bf16.mxu1 %v3187_v22 }
 0x1d3   : > { %2493 = vmatpush3.bf16.msra.mxu1 %v2796_v58 }
 0x1d4   : > { %2518 = vmatprep.subr.bf16.mxu1 %v3187_v22 }
 0x276   : > { %v1145_v32 = vpop.f32.mrf.mxu1 }
 0x277   : > { %v1146_v33 = vadd.f32 %v1145_v32, %v944_v30 }
 0x278   : > { %v1147_v34 = vpop.f32.mrf.mxu1 }
 0x279   : > { %v1148_v35 = vadd.f32 %v1147_v34, %v948_v31  ;;  %v1152_v36 = vmax.f32 %v1146_v33, 0.0 }
 0x27a   : > { %v1149_v37 = vpop.f32.mrf.mxu1 }
 0x27b   : > { %v1153_v38 = vmax.f32 %v1148_v35, 0.0  ;;  %v1187_v42 = vpack.c.bf16 %v1152_v36, %v1152_v36  ;;  %v2813_v37 = vld [vmem:[%s3642_s11 + $0xb8] sm:$0xff]  }
 0x27c   : > { %v1150_v39 = vpop.f32.mrf.mxu1 }
 0x27d   : > { %v1188_v40 = vpack.c.bf16 %v1153_v38, %v1153_v38 }
 0x27f   : > { %1323 = vmatprep.mubr.bf16.mxu0 %v1188_v40 }
 0x280   : > { %1324 = vmatmul.mubr.bf16.vlgmr.msra.gmra.mxu0 %v1187_v42  ;;  %v2815_v42 = vld [vmem:[%s3642_s11 + $0xa8] sm:$0xff]  }
 0x281   : > { %1511 = vmatpush1.bf16.msra.mxu0 %v2765_v41  ;;  %1542 = vmatprep.mubr.bf16.mxu0 %v3186_v0  ;;  %v2787_v0 = vld [vmem:[%s3513_s1 + $0x34] ss:$12 sps:$4 sm:$0xff]   ;;  %s3722_s1 = scalar_lea.hbm %s3843_s14, %s2565_s27 }
 0x282   : > { %1512 = vmatprep.subr.bf16.mxu0 %v2771_v43  ;;  %v2816_v43 = vld [vmem:[%s3642_s11 + $0xa0] sm:$0xff]  }
 0x285   : > { %1513 = vmatpush1.bf16.msra.mxu0 %v2769_v44  ;;  %v2817_v44 = vld [vmem:[%s3642_s11 + $0x98] sm:$0xff]  }
 0x286   : > { %1514 = vmatprep.subr.bf16.mxu0 %v2775_v45  ;;  %v1377_v45 = vsub.s32 2, %v3585_v1 }
 0x289   : > { %1515 = vmatpush1.bf16.msra.mxu0 %v2773_v46  ;;  %v2818_v46 = vld [vmem:[%s3642_s11 + $0x90] sm:$0xff]  }
 0x28a   : > { %1516 = vmatprep.subr.bf16.mxu0 %v2779_v47  ;;  %v1378_v47 = vrot.slane %v1364_v24, %v1377_v45 }
 0x28d   : > { %1517 = vmatpush1.bf16.msra.mxu0 %v2777_v48  ;;  %v2819_v48 = vld [vmem:[%s3642_s11 + $0x88] sm:$0xff]  }
 0x28e   : > { %1518 = vmatprep.subr.bf16.mxu0 %v2783_v49 }
 0x291   : > { %1519 = vmatpush1.bf16.msra.mxu0 %v2781_v50  ;;  %v2820_v50 = vld [vmem:[%s3642_s11 + $0x80] sm:$0xff]  }
 0x292   : > { %1520 = vmatprep.subr.bf16.mxu0 %v2787_v0 }
 0x295   : > { %1521 = vmatpush1.bf16.msra.mxu0 %v2785_v51  ;;  %v2351_v51 = vld [vmem:[%s750_s22] ss:$0 sm:$0xff] }
 0x296   : > { %1522 = vmatprep.subr.bf16.mxu0 %v2791_v53  ;;  %v2377_v53 = vld [vmem:[%s750_s22 + $0x1] ss:$0 sm:$0xff] }
 0x299   : > { %1523 = vmatpush1.bf16.msra.mxu0 %v2789_v54 }
 0x29a   : > { %1524 = vmatprep.subr.bf16.mxu0 %v2795_v56 }
 0x29d   : > { %1525 = vmatpush1.bf16.msra.mxu0 %v2793_v57 }
 0x29e   : > { %2498 = vmatprep.subr.bf16.mxu0 %v3187_v22 }
 0x340   : > { %v2436_v59 = vpop.f32.mrf.mxu0 }
 0x342   : > { %v2437_v61 = vpop.f32.mrf.mxu0 }
 0x343   : > { %v2438_v62 = vadd.f32 %v2437_v61, %v2436_v59 }
 0x344   : > { %v2439_v63 = vpop.f32.mrf.mxu0 }
 0x345   : > { %v1326_v3 = vadd.f32 %v2438_v62, %v2310_v60  ;;  %v2403_v63 = vld [vmem:[%s750_s22 + $0x2] ss:$0 sm:$0xff] }
 0x346   : > { %v2440_v5 = vpop.f32.mrf.mxu0 }
 0x347   : > { %v1331_v6 = vadd.f32 %v1326_v3, %v3546_v26  ;;  %v2801_v26 = vld [vmem:[%s3642_s11 + $0x28] sm:$0xff]   ;;  %s1940_s11 = scalar_lea.sflag [#allocation4], %s3473_s8 }
 0x349   : > { %v1365_v9 = vpack.c.bf16 %v1331_v6, %v1331_v6 }
 0x34b   : > { %1543 = vmatmul.mubr.bf16.vlgmr.msra.gmra.mxu0 %v1365_v9  ;;  %2495 = vmatmul.mubr.bf16.vlgmr.msra.gmra.mxu1 %v1365_v9 }
 0x34c   : > { %2499 = vmatpush3.bf16.msra.mxu0 %v2797_v7  ;;  %2519 = vmatpush3.bf16.msra.mxu1 %v2798_v8 }
 0x34d   : > { %2500 = vmatprep.subr.bf16.mxu0 %v3187_v22  ;;  %2520 = vmatprep.subr.bf16.mxu1 %v3187_v22 }
 0x34e   : > { %2514 = vmatprep.mubr.msk.bf16.mxu0 %vm3188_vm0, %v3187_v22  ;;  %2534 = vmatprep.mubr.msk.bf16.mxu1 %vm3188_vm0, %v3187_v22 }
 0x350   : > { %2501 = vmatpush3.bf16.msra.mxu0 %v2799_v10  ;;  %2521 = vmatpush3.bf16.msra.mxu1 %v2800_v11 }
 0x351   : > { %2502 = vmatprep.subr.bf16.mxu0 %v3187_v22  ;;  %2522 = vmatprep.subr.bf16.mxu1 %v3187_v22 }
 0x354   : > { %2503 = vmatpush3.bf16.msra.mxu0 %v2801_v26  ;;  %2523 = vmatpush3.bf16.msra.mxu1 %v2802_v12 }
 0x355   : > { %2504 = vmatprep.subr.bf16.mxu0 %v3187_v22  ;;  %2524 = vmatprep.subr.bf16.mxu1 %v3187_v22 }
 0x358   : > { %2505 = vmatpush3.bf16.msra.mxu0 %v2803_v13  ;;  %2525 = vmatpush3.bf16.msra.mxu1 %v2804_v14 }
 0x359   : > { %2506 = vmatprep.subr.bf16.mxu0 %v3187_v22  ;;  %2526 = vmatprep.subr.bf16.mxu1 %v3187_v22 }
 0x35c   : > { %2507 = vmatpush3.bf16.msra.mxu0 %v2805_v15  ;;  %2527 = vmatpush3.bf16.msra.mxu1 %v2806_v16 }
 0x35d   : > { %2508 = vmatprep.subr.bf16.mxu0 %v3187_v22  ;;  %2528 = vmatprep.subr.bf16.mxu1 %v3187_v22 }
 0x360   : > { %2509 = vmatpush3.bf16.msra.mxu0 %v2807_v17  ;;  %2529 = vmatpush3.bf16.msra.mxu1 %v2808_v18 }
 0x361   : > { %2510 = vmatprep.subr.bf16.mxu0 %v3187_v22  ;;  %2530 = vmatprep.subr.bf16.mxu1 %v3187_v22 }
 0x364   : > { %2511 = vmatpush3.bf16.msra.mxu0 %v2809_v19  ;;  %2531 = vmatpush3.bf16.msra.mxu1 %v2810_v20 }
 0x365   : > { %2512 = vmatprep.subr.bf16.mxu0 %v3187_v22  ;;  %2532 = vmatprep.subr.bf16.mxu1 %v3187_v22 }
 0x368   : > { %2513 = vmatpush3.bf16.msra.mxu0 %v2811_v21  ;;  %2533 = vmatpush3.bf16.msra.mxu1 %v2812_v23 }
 0x369   : > { %2538 = vmatprep.subr.bf16.mxu0 %v3187_v22 }
 0x40b   : > { %v1544_v28 = vpop.f32.mrf.mxu0  ;;  %v1585_v29 = vpop.f32.mrf.mxu1 }
 0x40c   : > { %v1545_v30 = vadd.f32 %v1544_v28, %v1370_v25  ;;  %v1586_v49 = vadd.f32 %v1585_v29, %v1378_v47 }
 0x40d   : > { %v1546_v31 = vpop.f32.mrf.mxu0  ;;  %v2496_v32 = vpop.f32.mrf.mxu1 }
 0x40e   : > { %v1591_v33 = vmax.f32 %v1545_v30, 0.0  ;;  %v1547_v34 = vadd.f32 %v1546_v31, %v1374_v27  ;;  %v1593_v0 = vmax.f32 %v1586_v49, 0.0 }
 0x40f   : > { %v1548_v35 = vpop.f32.mrf.mxu0  ;;  %v1588_v36 = vpop.f32.mrf.mxu1 }
 0x410   : > { %v1611_v38 = vpack.c.bf16 %v1591_v33, %v1591_v33  ;;  %v1592_v39 = vmax.f32 %v1547_v34, 0.0  ;;  %v1840_v1 = vpack.c.bf16 %v1593_v0, %v1593_v0 }
 0x411   : > { %v1549_v40 = vpop.f32.mrf.mxu0  ;;  %v2497_v2 = vpop.f32.mrf.mxu1 }
 0x412   : > { %v1725_v41 = vpack.c.bf16 %v1592_v39, %v1592_v39  ;;  %2515 = vmatmul.mubr.bf16.vlgmr.msra.gmra.mxu0 %v1611_v38 }
 0x413   : > { %2539 = vmatpush3.bf16.msra.mxu0 %v2813_v37  ;;  %2554 = vmatprep.mubr.msk.bf16.mxu0 %vm3188_vm0, %v3187_v22 }
 0x414   : > { %2535 = vmatmul.mubr.bf16.vlgmr.msra.gmra.mxu1 %v1725_v41  ;;  %2540 = vmatprep.subr.bf16.mxu0 %v3187_v22 }
 0x417   : > { %2541 = vmatpush3.bf16.msra.mxu0 %v2814_v4 }
 0x418   : > { %2542 = vmatprep.subr.bf16.mxu0 %v3187_v22 }
 0x41b   : > { %2543 = vmatpush3.bf16.msra.mxu0 %v2815_v42 }
 0x41c   : > { %2544 = vmatprep.subr.bf16.mxu0 %v3187_v22 }
 0x41f   : > { %2545 = vmatpush3.bf16.msra.mxu0 %v2816_v43 }
 0x420   : > { %2546 = vmatprep.subr.bf16.mxu0 %v3187_v22 }
 0x423   : > { %2547 = vmatpush3.bf16.msra.mxu0 %v2817_v44 }
 0x424   : > { %2548 = vmatprep.subr.bf16.mxu0 %v3187_v22 }
 0x427   : > { %2549 = vmatpush3.bf16.msra.mxu0 %v2818_v46 }
 0x428   : > { %2550 = vmatprep.subr.bf16.mxu0 %v3187_v22 }
 0x42b   : > { %2551 = vmatpush3.bf16.msra.mxu0 %v2819_v48 }
 0x42c   : > { %2552 = vmatprep.subr.bf16.mxu0 %v3187_v22 }
 0x42f   : > { %2553 = vmatpush3.bf16.msra.mxu0 %v2820_v50 }
 0x432   : > { %2555 = vmatmul.mubr.bf16.vlgmr.msra.gmra.mxu0 %v1840_v1 }
 0x4d2   : > { %v1700_v52 = vpop.f32.mrf.mxu0 }
 0x4d3   : > { %v1701_v54 = vadd.f32 %v2351_v51, %v1700_v52 }
 0x4d4   : > { %v2516_v55 = vpop.f32.mrf.mxu0  ;;  %v1814_v56 = vpop.f32.mrf.mxu1 }
 0x4d5   : > { %1936 = vst [vmem:[%s742_s24] sm:$0xff] %v1701_v54  ;;  %v1815_v57 = vadd.f32 %v2377_v53, %v1814_v56 }
 0x4d6   : > { %v1703_v22 = vpop.f32.mrf.mxu0  ;;  %v2536_v58 = vpop.f32.mrf.mxu1 }
 0x4d7   : > { %v1820_v59 = vmax.f32 %v1815_v57, 0.0 }
 0x4d8   : > { %v2517_v60 = vpop.f32.mrf.mxu0  ;;  %v1817_v61 = vpop.f32.mrf.mxu1 }
 0x4d9   : > { %1937 = vst [vmem:[%s742_s24 + $0x8] sm:$0xff] %v1820_v59 }
 0x4da   : > { %v2537_v62 = vpop.f32.mrf.mxu1 }
 0x4f2   : > { %v1929_v3 = vpop.f32.mrf.mxu0 }
 0x4f3   : > { %v1930_v5 = vadd.f32 %v2403_v63, %v1929_v3 }
 0x4f4   : > { %v2556_v6 = vpop.f32.mrf.mxu0 }
 0x4f5   : > { %v1935_v7 = vmax.f32 %v1930_v5, 0.0 }
 0x4f6   : > { %v1932_v8 = vpop.f32.mrf.mxu0 }
 0x4f7   : > { %1938 = vst [vmem:[%s742_s24 + $0x10] sm:$0xff] %v1935_v7 }
 0x4f8   : > { %v2557_v9 = vpop.f32.mrf.mxu0 }
 0x4f9   : > { %3086 = shalt.err (!%p3083_p7)
}
 0x4fa   : > { %s3087_s28 = scalar_lea.hbm %s3722_s1, 384  ;;  %s3091_s10 = scalar_lea.hbm %s3843_s14, 768 }
 0x4fb   : > { %p3088_p10 = scmp.ne.s32.totalorder %s3722_s1, %s3087_s28  ;;  %p3092_p8 = scmp.lt.s32.totalorder %s3722_s1, %s3843_s14 }
 0x4fc   : > { %p3093_p0 = scmp.lt.s32.totalorder %s3091_s10, %s3087_s28 }
 0x4fd   : > { %p3089_p13 = pnand %p3088_p10, %p3305_p9 }
 0x4fe   : > { %p3094_p1 = por %p3093_p0, %p3092_p8 }
 0x4ff   : > { %p3090_p2 = pneg %p3089_p13 }
 0x501   : > { %p3095_p3 = pnand %p3094_p1, %p3090_p2 }
 0x503   : > { %3098 = shalt.err (!%p3095_p3)
}
 0x504   : > { %2584 = dma.vmem_to_hbm [thread:$0]  (%p3305_p9), %s3724_s13, 384, %s3722_s1, %s1940_s11  }
 0x505 PF: > { %s3844_s20 = sld [smem:[#allocation24_spill]]  ;;  %p2615_p4 = pnand %p2234_p12, %p3312_p11 }
 0x506   : > { %s3846_s16 = sld [smem:[#allocation27_spill]] }
 0x507   : > { %p2616_p5 = pneg %p2615_p4 }
 0x50b   : > { %s1968_s24 = sand.u32 1, %s3844_s20  }
 0x50c   : > { %s1969_s27 = scalar_lea.sflag [#allocation4], %s1968_s24 }
 0x50d   : > { %3144 = dma.done.wait (%p2616_p5), %s1969_s27, 384  }
 0x50e   : > { %3146 = vsyncadd (%p2616_p5), %s1969_s27, 4294966912  ;;  %s39_s22 = sadd.s32 1, %s3846_s16   ;;  %s3847_s19 = sld [smem:[#allocation25_spill]] }
 0x50f   : > { %p36_p6 = scmp.ge.s32.totalorder %s39_s22, 4   ;;  %s3848_s3 = sld [smem:[#allocation32_spill]] }
 0x510   : > { %s3849_s13 = sld [smem:[#allocation29_spill]]  ;;  %s3850_s17 = smov %s3153_s18 }
 0x511   : > { %s3853_s20 = smov %s3165_s21 }
 0x512   :  { %38 = sbr.rel (!%p36_p6) target bundleno = 20 (0x14), region = 215 }
 0x514   : > { %s3851_s18 = smov %s3847_s19 }
 0x515   : > { %s3852_s19 = smov %s3848_s3 }
 0x516   : > { %s3854_s21 = smov %s3849_s13 }
 0x517   :  { %1974 = vsyncpa [#allocation3], 1 }
 0x518   :  { %1976 = vsyncpa [#allocation3 + $0x1], 1 }
 0x519   :  { %1977 = vsyncpa [#allocation6], 1 }
 0x51a   :  { %1979 = vsyncpa [#allocation6 + $0x1], 1 }
 0x51b   :  { %1980 = vsyncpa [#allocation9], 1 }
 0x51c   :  { %1982 = vsyncpa [#allocation9 + $0x1], 1 }
 0x51d   :  { %1983 = vsyncpa [#allocation12], 1 }
 0x51e   :  { %1985 = vsyncpa [#allocation12 + $0x1], 1 }
 0x51f   :  { %1986 = vsyncpa [#allocation15], 1 }
 0x520   :  { %1988 = vsyncpa [#allocation15 + $0x1], 1 }
 0x521   :  { %1989 = vsyncpa [#allocation4], 1 }
 0x522   :  { %1991 = vsyncpa [#allocation4 + $0x1], 1 }

</bundles_post_ra>
